<compile_context>
chip_gen: v7x
topology: tpu7x:2x2x1
jax: 0.10.0
libtpu: 0.0.40
codegen_flags: <defaults>
</compile_context>

<pallas_src>
import functools

import jax
import jax.numpy as jnp
from jax.experimental import pallas as pl
from jax.experimental.pallas import tpu as pltpu


ACT_DTYPE = jnp.bfloat16   # HBM/VMEM storage dtype for activations and weights


# ----------------------------------------------------------------------------
# Pallas kernel: fused (GN-apply+SiLU) -> pad -> 3x3 conv (plain or sub-pixel
# upsampling) -> bias -> (SiLU) -> (per-tile GN stats)
# ----------------------------------------------------------------------------
def _conv_kernel(*refs, upsample, act, fuse_gn, collect_stats):
    """One (batch, row-tile) grid step.

    Ref order: xb(1,1,TB,W,Cin) body rows, xp/xn(1,1,1,W,Cin) halo rows,
               w(K,Cin,Cout) tap/phase matrices, b(1,Cout) bias,
               [a,c](1,1,Cin) GroupNorm per-channel scale/shift (f32),
               o output block, [s](1,1,2,Cout) per-tile [sum, sumsq] stats,
               pad(TB+2,W+2,Cin) VMEM scratch (zero-padded input window).
    """
    xb_ref, xp_ref, xn_ref, w_ref, b_ref = refs[:5]
    i = 5
    if fuse_gn:
        a_ref, c_ref = refs[5], refs[6]
        i = 7
    o_ref = refs[i]; i += 1
    if collect_stats:
        s_ref = refs[i]; i += 1
    pad_ref = refs[i]

    t = pl.program_id(1)
    nt = pl.num_programs(1)
    tb, w, cin = xb_ref.shape[2], xb_ref.shape[3], xb_ref.shape[4]
    cout = b_ref.shape[-1]

    def gn_silu(v):
        # GroupNorm apply (precomputed per-channel affine) + SiLU, in f32.
        if not fuse_gn:
            return v
        r = v.astype(jnp.float32) * a_ref[...] + c_ref[...]
        r = r * jax.nn.sigmoid(r)
        return r.astype(v.dtype)

    body = gn_silu(xb_ref[0, 0])                       # (TB, W, Cin)
    prev = gn_silu(xp_ref[0, 0])                       # (1, W, Cin)
    nxt = gn_silu(xn_ref[0, 0])
    # Halo rows double as the conv's SAME zero padding at the image borders, so
    # they are zeroed AFTER the fused GN/SiLU transform (this was the bug in the
    # previous version: silu(shift) was used as "zero" padding).
    zrow = jnp.zeros_like(prev)
    prev = jnp.where(t == 0, zrow, prev)
    nxt = jnp.where(t == nt - 1, zrow, nxt)

    # Assemble the zero-padded input window in persistent VMEM scratch: the whole
    # scratch is rewritten every step (no cross-step state), so the row axis can
    # stay "parallel" under megacore partitioning.
    pad_ref[1:tb + 1, 1:w + 1, :] = body
    pad_ref[0:1, 1:w + 1, :] = prev
    pad_ref[tb + 1:tb + 2, 1:w + 1, :] = nxt
    zcol = jnp.zeros((tb + 2, 1, cin), body.dtype)
    pad_ref[:, 0:1, :] = zcol
    pad_ref[:, w + 1:w + 2, :] = zcol

    bias = b_ref[...].astype(jnp.float32)              # (1, Cout)

    def window(rw, cw):
        # Shifted (TB, W, Cin) view of the padded tile, as a (TB*W, Cin) matrix.
        return pad_ref[rw:rw + tb, cw:cw + w, :].reshape(tb * w, cin)

    def conv_taps(taps):
        # Unrolled accumulating K=Cin dots (no lane-axis im2col concatenate).
        acc = jnp.zeros((tb * w, cout), jnp.float32)
        for rw, cw, k in taps:
            acc = acc + jnp.dot(window(rw, cw), w_ref[k],
                                preferred_element_type=jnp.float32)
        y = acc + bias
        if act:
            y = y * jax.nn.sigmoid(y)                  # fused SiLU
        return y.astype(o_ref.dtype)

    ssum = jnp.zeros((1, cout), jnp.float32)
    ssq = jnp.zeros((1, cout), jnp.float32)

    def add_stats(yq, ssum, ssq):
        # Stats taken from the stored bf16 activation so GroupNorm statistics
        # match the reference (bf16 storage) semantics exactly.
        yf = yq.astype(jnp.float32)
        return (ssum + jnp.sum(yf, axis=0, keepdims=True),
                ssq + jnp.sum(yf * yf, axis=0, keepdims=True))

    if not upsample:
        yq = conv_taps([(dy, dx, dy * 3 + dx)
                        for dy in range(3) for dx in range(3)])
        o_ref[0, 0] = yq.reshape(tb, w, cout)
        if collect_stats:
            ssum, ssq = add_stats(yq, ssum, ssq)
    else:
        # Sub-pixel decomposition of nearest-2x-upsample + 3x3 conv: 4 phase
        # convolutions with 2x2 effective taps on the original-resolution rows
        # (no jnp.repeat, 4*Cin instead of 9*Cin MACs per output pixel).
        # out[2i+pa, 2j+pb, c] is stored at o[i, pa, j, pb*Cout + c], so the HBM
        # store is lane-dense (last dim = 2*Cout) and the wrapper reshape is free.
        for pa in range(2):
            for pb in range(2):
                yq = conv_taps([(pa + ro, pb + co,
                                 (pa * 2 + pb) * 4 + ro * 2 + co)
                                for ro in range(2) for co in range(2)])
                o_ref[0, 0, :, pa, :, pb * cout:(pb + 1) * cout] = (
                    yq.reshape(tb, w, cout))
                if collect_stats:
                    ssum, ssq = add_stats(yq, ssum, ssq)

    if collect_stats:
        # Per-row-tile partial stats (reduced in the wrapper) -> no cross-tile
        # accumulator, so the row axis stays parallel on v7x (2 TensorCores).
        s_ref[0, 0, 0:1, :] = ssum
        s_ref[0, 0, 1:2, :] = ssq


# ----------------------------------------------------------------------------
# Wrapper (pallas_call plumbing)
# ----------------------------------------------------------------------------
def _vmem_params():
    """Per-generation VMEM budgets (per-step activation budget, scoped limit)."""
    try:
        cap = int(pltpu.get_tpu_info().vmem_capacity_bytes)
    except Exception:
        cap = 64 * 2 ** 20                       # conservative (v7x per-core VMEM)
    # v5e/v6e (128 MiB) -> ~22 MiB per step / ~105 MiB limit;
    # v7x (64 MiB)      -> ~11 MiB per step / ~52 MiB limit.
    return int(cap * 0.17), int(cap * 0.82)


def _pick_rows(hin, w, cin, cout, upsample, per_step_bytes, weight_bytes):
    """Input rows per grid step, sized to the per-step VMEM budget."""
    avail = max(per_step_bytes - 2 * weight_bytes, 256 * 1024)
    # bf16 body (double-buffered) + scratch + operand staging, f32 accumulator,
    # bf16 output block (double-buffered; 4x larger for the upsampling layers).
    per_row = w * (10 * cin + (20 if upsample else 8) * cout) + 4 * (w + 2) * cin
    cap = max(1, int(avail) // int(per_row))
    cap = min(cap, hin)
    if hin >= 8:
        cap = min(cap, max(1, hin // 2))   # keep >=2 row tiles so the pipeline overlaps
    # TODO(synk): allow a ragged last tile; for now TB must divide Hin exactly.
    tb = 1
    for d in range(1, hin + 1):
        if hin % d == 0 and d <= cap:
            tb = d
    return tb


def conv3x3(x, wk, bk, *, upsample=False, act=False, gn_scale=None,
            gn_shift=None, collect_stats=False):
    """Fused zero-pad + 3x3 conv (+2x nearest upsample) + bias (+SiLU) (+GN).

    x : (N, Hin, W, Cin) NHWC bf16
    wk: (9, Cin, Cout) tap matrices, or (16, Cin, Cout) sub-pixel phase matrices
    bk: (1, Cout) f32
    gn_scale/gn_shift: optional (N, 1, Cin) f32 per-channel affine applied (then
      SiLU) to the input (fused GroupNorm for conv_out).
    collect_stats: also return (N, 2, Cout) f32 per-channel [sum, sumsq] of output.
    """
    n, hin, w, cin = x.shape
    cout = bk.shape[-1]
    fuse_gn = gn_scale is not None
    assert not (upsample and fuse_gn)

    per_step, vmem_limit = _vmem_params()
    tb = _pick_rows(hin, w, cin, cout, upsample, per_step, wk.size * 2)
    nt = hin // tb

    x5 = x.reshape(n, nt, tb, w, cin)

    in_specs = [
        pl.BlockSpec((1, 1, tb, w, cin), lambda b_, t: (b_, t, 0, 0, 0)),
        pl.BlockSpec((1, 1, 1, w, cin),
                     lambda b_, t: (b_, jnp.maximum(t - 1, 0), tb - 1, 0, 0)),
        pl.BlockSpec((1, 1, 1, w, cin),
                     lambda b_, t: (b_, jnp.minimum(t + 1, nt - 1), 0, 0, 0)),
        pl.BlockSpec(wk.shape, lambda b_, t: (0, 0, 0)),
        pl.BlockSpec((1, cout), lambda b_, t: (0, 0)),
    ]
    args = [x5, x5, x5, wk, bk]
    if fuse_gn:
        in_specs += [pl.BlockSpec((1, 1, cin), lambda b_, t: (b_, 0, 0)),
                     pl.BlockSpec((1, 1, cin), lambda b_, t: (b_, 0, 0))]
        args += [gn_scale, gn_shift]

    if upsample:
        out_shape = [jax.ShapeDtypeStruct((n, nt, tb, 2, w, 2 * cout), x.dtype)]
        out_specs = [pl.BlockSpec((1, 1, tb, 2, w, 2 * cout),
                                  lambda b_, t: (b_, t, 0, 0, 0, 0))]
    else:
        out_shape = [jax.ShapeDtypeStruct((n, nt, tb, w, cout), x.dtype)]
        out_specs = [pl.BlockSpec((1, 1, tb, w, cout),
                                  lambda b_, t: (b_, t, 0, 0, 0))]
    if collect_stats:
        out_shape.append(jax.ShapeDtypeStruct((n, nt, 2, cout), jnp.float32))
        out_specs.append(pl.BlockSpec((1, 1, 2, cout),
                                      lambda b_, t: (b_, t, 0, 0)))

    kernel = functools.partial(_conv_kernel, upsample=upsample, act=act,
                               fuse_gn=fuse_gn, collect_stats=collect_stats)
    # TODO(synk): on v5e, pipeline_mode=pl.Buffered(3) on the body input of the
    #             small-channel layers would hide more of the DMA latency.
    outs = pl.pallas_call(
        kernel,
        grid=(n, nt),
        in_specs=in_specs,
        out_specs=out_specs,
        out_shape=out_shape,
        scratch_shapes=[pltpu.VMEM((tb + 2, w + 2, cin), x.dtype)],
        compiler_params=pltpu.CompilerParams(
            dimension_semantics=("parallel", "parallel"),
            vmem_limit_bytes=vmem_limit),
    )(*args)

    y = outs[0]
    y = y.reshape(n, 2 * hin, 2 * w, cout) if upsample else y.reshape(n, hin, w, cout)
    if collect_stats:
        return y, jnp.sum(outs[1], axis=1)             # (N, 2, Cout)
    return y


def _groupnorm_affine(stats, gamma, beta, *, groups, hw, eps=1e-6):
    """(N,2,C) per-channel [sum,sumsq] -> per-channel affine (scale, shift), f32."""
    n, _, c = stats.shape
    cg = c // groups
    s = stats[:, 0, :].reshape(n, groups, cg).sum(-1)          # (N, G)
    sq = stats[:, 1, :].reshape(n, groups, cg).sum(-1)
    cnt = float(hw * cg)
    mean = s / cnt
    # TODO(synk): E[x^2]-E[x]^2 can lose precision for huge images; a per-tile
    #             Welford/Chan combine would be more robust at production scales.
    var = jnp.maximum(sq / cnt - mean * mean, 0.0)
    inv = jax.lax.rsqrt(var + eps)                             # (N, G)
    mean_c = jnp.repeat(mean, cg, axis=1)                      # (N, C)
    inv_c = jnp.repeat(inv, cg, axis=1)
    a = inv_c * gamma[None, :]
    sh = beta[None, :] - mean_c * a
    return (a.reshape(n, 1, c).astype(jnp.float32),
            sh.reshape(n, 1, c).astype(jnp.float32))


# ----------------------------------------------------------------------------
# Decoder: parameters + weight prep + forward
# ----------------------------------------------------------------------------
def init_decoder_params(key, latent_channels, out_channels, block_out_channels):
    rev = list(reversed(block_out_channels))
    n_up = len(rev) - 1
    keys = jax.random.split(key, 2 + max(n_up, 1))

    def conv_p(k, cin, cout):
        kw, kb = jax.random.split(k)
        return {"w": 0.05 * jax.random.normal(kw, (3, 3, cin, cout), jnp.float32),
                "b": 0.02 * jax.random.normal(kb, (cout,), jnp.float32)}

    c_last = rev[-1]
    groups = min(32, c_last)
    while c_last % groups:                     # GroupNorm requires C % groups == 0
        groups -= 1
    kg = jax.random.split(keys[0], 3)
    return {
        "conv_in": conv_p(keys[0], latent_channels, rev[0]),
        "up_blocks": [conv_p(keys[1 + i], rev[i], rev[i + 1]) for i in range(n_up)],
        "gn_gamma": 1.0 + 0.1 * jax.random.normal(kg[1], (c_last,), jnp.float32),
        "gn_beta": 0.05 * jax.random.normal(kg[2], (c_last,), jnp.float32),
        "gn_groups": groups,
        "conv_out": conv_p(keys[-1], c_last, out_channels),
    }


def _fold_phase_weights(wb):
    """(3,3,Cin,Cout) bf16 taps -> (16,Cin,Cout) bf16 sub-pixel phase matrices.

    Phase (pa,pb) of nearest-2x-upsample + 3x3 SAME conv is a 2x2 conv over the
    original resolution; its taps are sums of sub-blocks of the 3x3 kernel.
    Summing the already bf16-rounded taps keeps the deviation from the reference
    to a single rounding of each sum.
    """
    grp = {0: ((0,), (1, 2)), 1: ((0, 1), (2,))}   # tap offsets 0/1 per phase
    mats = []
    for pa in range(2):
        for pb in range(2):
            for ro in range(2):
                for co in range(2):
                    acc = jnp.zeros(wb.shape[2:], jnp.float32)
                    for dy in grp[pa][ro]:
                        for dx in grp[pb][co]:
                            acc = acc + wb[dy, dx].astype(jnp.float32)
                    mats.append(acc.astype(wb.dtype))
    return jnp.stack(mats, axis=0)


def _prep_conv(p, *, upsample=False, cin_pad=0, cout_pad=0):
    w = p["w"]                                      # (3,3,cin,cout) f32
    bias = p["b"]                                   # (cout,) f32
    cin, cout = w.shape[2], w.shape[3]
    if cin_pad > cin:
        w = jnp.pad(w, ((0, 0), (0, 0), (0, cin_pad - cin), (0, 0)))
    if cout_pad > cout:
        w = jnp.pad(w, ((0, 0), (0, 0), (0, 0), (0, cout_pad - cout)))
        bias = jnp.pad(bias, (0, cout_pad - cout))
    wb = w.astype(ACT_DTYPE)
    wk = _fold_phase_weights(wb) if upsample else wb.reshape(9, *wb.shape[2:])
    return {"wk": wk, "bk": bias.astype(jnp.float32).reshape(1, -1)}


def prepare_params(params, latent_channels, out_channels):
    lat_pad = max(8, -(-latent_channels // 8) * 8)      # lane-friendlier conv_in
    cout_pad = -(-out_channels // 128) * 128            # lane-dense conv_out store
    return {
        "lat_pad": lat_pad,
        "out_channels": out_channels,
        "conv_in": _prep_conv(params["conv_in"], cin_pad=lat_pad),
        "up_blocks": [_prep_conv(p, upsample=True) for p in params["up_blocks"]],
        "gn_gamma": params["gn_gamma"],
        "gn_beta": params["gn_beta"],
        "gn_groups": params["gn_groups"],
        "conv_out": _prep_conv(params["conv_out"], cout_pad=cout_pad),
    }


def decoder_forward(z_nchw, prep):
    """z: (N, latent_C, H, W) -> (N, out_C, H*2^k, W*2^k). Matches Decoder.forward."""
    x = jnp.transpose(z_nchw, (0, 2, 3, 1)).astype(ACT_DTYPE)  # NCHW -> NHWC, bf16
    lat = x.shape[-1]
    if prep["lat_pad"] > lat:
        x = jnp.pad(x, ((0, 0), (0, 0), (0, 0), (0, prep["lat_pad"] - lat)))

    n_up = len(prep["up_blocks"])
    out = conv3x3(x, prep["conv_in"]["wk"], prep["conv_in"]["bk"],
                  upsample=False, act=False, collect_stats=(n_up == 0))
    if n_up == 0:
        x, stats = out
    else:
        x = out
        stats = None
        for i, blk in enumerate(prep["up_blocks"]):
            last = (i == n_up - 1)
            res = conv3x3(x, blk["wk"], blk["bk"], upsample=True, act=True,
                          collect_stats=last)
            if last:
                x, stats = res
            else:
                x = res

    # conv_norm_out + conv_act + conv_out fused into one kernel pass.
    _, hf, wf, _ = x.shape
    a, c = _groupnorm_affine(stats, prep["gn_gamma"], prep["gn_beta"],
                             groups=prep["gn_groups"], hw=hf * wf)
    y = conv3x3(x, prep["conv_out"]["wk"], prep["conv_out"]["bk"],
                upsample=False, act=False, gn_scale=a, gn_shift=c)
    y = y[..., :prep["out_channels"]]                           # drop lane padding
    return jnp.transpose(y, (0, 3, 1, 2)).astype(z_nchw.dtype)


# ----------------------------------------------------------------------------
# Plain-XLA reference with the same bf16 storage boundaries (sanity check)
# ----------------------------------------------------------------------------
def decoder_reference(z_nchw, params):
    def conv(x, p):
        y = jax.lax.conv_general_dilated(
            x, p["w"].astype(ACT_DTYPE), window_strides=(1, 1), padding="SAME",
            dimension_numbers=("NHWC", "HWIO", "NHWC"),
            preferred_element_type=jnp.float32)
        return y + p["b"].astype(jnp.float32).reshape(1, 1, 1, -1)

    x = jnp.transpose(z_nchw, (0, 2, 3, 1)).astype(ACT_DTYPE)
    x = conv(x, params["conv_in"]).astype(ACT_DTYPE)
    for blk in params["up_blocks"]:
        x = jnp.repeat(jnp.repeat(x, 2, axis=1), 2, axis=2)
        y = conv(x, blk)
        x = (y * jax.nn.sigmoid(y)).astype(ACT_DTYPE)

    xf = x.astype(jnp.float32)
    n, h, w, c = xf.shape
    g = params["gn_groups"]
    xg = xf.reshape(n, h * w, g, c // g)
    mean = xg.mean(axis=(1, 3), keepdims=True)
    var = xg.var(axis=(1, 3), keepdims=True)
    y = ((xg - mean) * jax.lax.rsqrt(var + 1e-6)).reshape(n, h, w, c)
    y = (y * params["gn_gamma"].reshape(1, 1, 1, -1)
         + params["gn_beta"].reshape(1, 1, 1, -1))
    y = y * jax.nn.sigmoid(y)
    x = y.astype(ACT_DTYPE)

    y = conv(x, params["conv_out"]).astype(ACT_DTYPE)
    return jnp.transpose(y, (0, 3, 1, 2)).astype(z_nchw.dtype)


# ----------------------------------------------------------------------------
if __name__ == "__main__":
    N = 2
    latent_channels = 4
    out_channels = 3
    block_out_channels = (32, 64)     # Decoder reverses -> [64, 32]; one UpBlock
    H = W = 16

    key = jax.random.PRNGKey(0)
    params = init_decoder_params(key, latent_channels, out_channels,
                                 block_out_channels)
    prep = prepare_params(params, latent_channels, out_channels)
    z = jax.random.normal(key, (N, latent_channels, H, W), jnp.float32)

    out = jax.block_until_ready(decoder_forward(z, prep))
    assert out.shape == (N, out_channels, 2 * H, 2 * W), out.shape

    ref = jax.block_until_ready(decoder_reference(z, params))
    err = jnp.abs(out.astype(jnp.float32) - ref.astype(jnp.float32))
    max_err = float(jnp.max(err))
    mean_err = float(jnp.mean(err))
    # Tolerance: the sub-pixel phase-weight folding re-rounds sums of bf16 taps
    # to bf16 (~2^-9 relative weight perturbation); everything else matches the
    # reference bf16 pipeline to ~1e-4.  Estimated worst case is a few 1e-3.
    assert max_err < 2.5e-2 and mean_err < 5e-3, (max_err, mean_err)

    print("KERNEL_OK")
</pallas_src>

<mosaic_0001>
module attributes {stable_mosaic.version = 11 : i64} {
  func.func @_conv_kernel(%arg0: i32, %arg1: i32, %arg2: memref<1x1x8x16x8xbf16, #tpu.memory_space<vmem>>, %arg3: memref<1x1x1x16x8xbf16, #tpu.memory_space<vmem>>, %arg4: memref<1x1x1x16x8xbf16, #tpu.memory_space<vmem>>, %arg5: memref<9x8x64xbf16, #tpu.memory_space<vmem>>, %arg6: memref<1x64xf32, #tpu.memory_space<vmem>>, %arg7: memref<1x1x8x16x64xbf16, #tpu.memory_space<vmem>>, %arg8: memref<10x18x8xbf16, #tpu.memory_space<vmem>>) attributes {dimension_semantics = [#tpu.dimension_semantics<parallel>, #tpu.dimension_semantics<parallel>], iteration_bounds = array<i64: 2, 2>, scalar_prefetch = 0 : i64, scratch_operands = 1 : i64, tpu.core_type = #tpu.core_type<tc>, window_params = [{transform_indices = @transform_0, window_bounds = array<i64: 1, 1, 8, 16, 8>}, {transform_indices = @transform_1, window_bounds = array<i64: 1, 1, 1, 16, 8>}, {transform_indices = @transform_2, window_bounds = array<i64: 1, 1, 1, 16, 8>}, {pipeline_mode = #tpu.pipeline_mode<synchronous>, transform_indices = @transform_3, window_bounds = array<i64: 9, 8, 64>}, {pipeline_mode = #tpu.pipeline_mode<synchronous>, transform_indices = @transform_4, window_bounds = array<i64: 1, 64>}, {transform_indices = @transform_5, window_bounds = array<i64: 1, 1, 8, 16, 64>}]} {
    %c0 = arith.constant 0 : index
    %c0_0 = arith.constant 0 : index
    %c0_1 = arith.constant 0 : index
    %c0_2 = arith.constant 0 : index
    %c0_3 = arith.constant 0 : index
    %0 = vector.load %arg2[%c0, %c0_0, %c0_1, %c0_2, %c0_3] : memref<1x1x8x16x8xbf16, #tpu.memory_space<vmem>>, vector<1x1x8x16x8xbf16>
    %1 = vector.shape_cast %0 : vector<1x1x8x16x8xbf16> to vector<8x16x8xbf16>
    %c0_4 = arith.constant 0 : index
    %c0_5 = arith.constant 0 : index
    %c0_6 = arith.constant 0 : index
    %c0_7 = arith.constant 0 : index
    %c0_8 = arith.constant 0 : index
    %2 = vector.load %arg3[%c0_4, %c0_5, %c0_6, %c0_7, %c0_8] : memref<1x1x1x16x8xbf16, #tpu.memory_space<vmem>>, vector<1x1x1x16x8xbf16>
    %3 = vector.shape_cast %2 : vector<1x1x1x16x8xbf16> to vector<1x16x8xbf16>
    %c0_9 = arith.constant 0 : index
    %c0_10 = arith.constant 0 : index
    %c0_11 = arith.constant 0 : index
    %c0_12 = arith.constant 0 : index
    %c0_13 = arith.constant 0 : index
    %4 = vector.load %arg4[%c0_9, %c0_10, %c0_11, %c0_12, %c0_13] : memref<1x1x1x16x8xbf16, #tpu.memory_space<vmem>>, vector<1x1x1x16x8xbf16>
    %5 = vector.shape_cast %4 : vector<1x1x1x16x8xbf16> to vector<1x16x8xbf16>
    %cst = arith.constant 0.000000e+00 : bf16
    %6 = vector.broadcast %cst : bf16 to vector<1x16x8xbf16>
    %c0_i32 = arith.constant 0 : i32
    %7 = arith.cmpi eq, %arg1, %c0_i32 : i32
    %8 = arith.select %7, %6, %3 : vector<1x16x8xbf16>
    %c1_i32 = arith.constant 1 : i32
    %9 = arith.cmpi eq, %arg1, %c1_i32 : i32
    %10 = arith.select %9, %6, %5 : vector<1x16x8xbf16>
    %c1 = arith.constant 1 : index
    %c1_14 = arith.constant 1 : index
    %c0_15 = arith.constant 0 : index
    %11 = vector.load %arg8[%c1, %c1_14, %c0_15] : memref<10x18x8xbf16, #tpu.memory_space<vmem>>, vector<8x16x8xbf16>
    tpu.vector_store %arg8[%c1, %c1_14, %c0_15], %1 {strides = array<i32>} : memref<10x18x8xbf16, #tpu.memory_space<vmem>>, vector<8x16x8xbf16>,
    %c0_16 = arith.constant 0 : index
    %c1_17 = arith.constant 1 : index
    %c0_18 = arith.constant 0 : index
    %12 = vector.load %arg8[%c0_16, %c1_17, %c0_18] : memref<10x18x8xbf16, #tpu.memory_space<vmem>>, vector<1x16x8xbf16>
    tpu.vector_store %arg8[%c0_16, %c1_17, %c0_18], %8 {strides = array<i32>} : memref<10x18x8xbf16, #tpu.memory_space<vmem>>, vector<1x16x8xbf16>,
    %c9 = arith.constant 9 : index
    %c1_19 = arith.constant 1 : index
    %c0_20 = arith.constant 0 : index
    %13 = vector.load %arg8[%c9, %c1_19, %c0_20] : memref<10x18x8xbf16, #tpu.memory_space<vmem>>, vector<1x16x8xbf16>
    tpu.vector_store %arg8[%c9, %c1_19, %c0_20], %10 {strides = array<i32>} : memref<10x18x8xbf16, #tpu.memory_space<vmem>>, vector<1x16x8xbf16>,
    %cst_21 = arith.constant 0.000000e+00 : bf16
    %14 = vector.broadcast %cst_21 : bf16 to vector<10x1x8xbf16>
    %c0_22 = arith.constant 0 : index
    %c0_23 = arith.constant 0 : index
    %c0_24 = arith.constant 0 : index
    %15 = vector.load %arg8[%c0_22, %c0_23, %c0_24] : memref<10x18x8xbf16, #tpu.memory_space<vmem>>, vector<10x1x8xbf16>
    tpu.vector_store %arg8[%c0_22, %c0_23, %c0_24], %14 {strides = array<i32>} : memref<10x18x8xbf16, #tpu.memory_space<vmem>>, vector<10x1x8xbf16>,
    %c0_25 = arith.constant 0 : index
    %c17 = arith.constant 17 : index
    %c0_26 = arith.constant 0 : index
    %16 = vector.load %arg8[%c0_25, %c17, %c0_26] : memref<10x18x8xbf16, #tpu.memory_space<vmem>>, vector<10x1x8xbf16>
    tpu.vector_store %arg8[%c0_25, %c17, %c0_26], %14 {strides = array<i32>} : memref<10x18x8xbf16, #tpu.memory_space<vmem>>, vector<10x1x8xbf16>,
    %c0_27 = arith.constant 0 : index
    %c0_28 = arith.constant 0 : index
    %17 = vector.load %arg6[%c0_27, %c0_28] : memref<1x64xf32, #tpu.memory_space<vmem>>, vector<1x64xf32>
    %cst_29 = arith.constant 0.000000e+00 : f32
    %18 = vector.broadcast %cst_29 : f32 to vector<128x64xf32>
    %c0_30 = arith.constant 0 : index
    %c0_31 = arith.constant 0 : index
    %c0_32 = arith.constant 0 : index
    %19 = vector.load %arg8[%c0_30, %c0_31, %c0_32] : memref<10x18x8xbf16, #tpu.memory_space<vmem>>, vector<8x16x8xbf16>
    %20 = vector.shape_cast %19 : vector<8x16x8xbf16> to vector<128x8xbf16>
    %c0_33 = arith.constant 0 : index
    %c0_34 = arith.constant 0 : index
    %c0_35 = arith.constant 0 : index
    %21 = vector.load %arg5[%c0_33, %c0_34, %c0_35] : memref<9x8x64xbf16, #tpu.memory_space<vmem>>, vector<1x8x64xbf16>
    %22 = vector.shape_cast %21 : vector<1x8x64xbf16> to vector<8x64xbf16>
    %cst_36 = arith.constant dense<0.000000e+00> : vector<128x64xf32>
    %23 = tpu.matmul %20, %22, %cst_36 {dimension_numbers = #tpu.dot_dimension_numbers<[1], [0], [0], [1], [0, 0, 1, 1], [], []>} : vector<128x8xbf16>, vector<8x64xbf16>, vector<128x64xf32> -> vector<128x64xf32>
    %24 = arith.addf %18, %23 : vector<128x64xf32>
    %c0_37 = arith.constant 0 : index
    %c1_38 = arith.constant 1 : index
    %c0_39 = arith.constant 0 : index
    %25 = vector.load %arg8[%c0_37, %c1_38, %c0_39] : memref<10x18x8xbf16, #tpu.memory_space<vmem>>, vector<8x16x8xbf16>
    %26 = vector.shape_cast %25 : vector<8x16x8xbf16> to vector<128x8xbf16>
    %c1_40 = arith.constant 1 : index
    %c0_41 = arith.constant 0 : index
    %c0_42 = arith.constant 0 : index
    %27 = vector.load %arg5[%c1_40, %c0_41, %c0_42] : memref<9x8x64xbf16, #tpu.memory_space<vmem>>, vector<1x8x64xbf16>
    %28 = vector.shape_cast %27 : vector<1x8x64xbf16> to vector<8x64xbf16>
    %cst_43 = arith.constant dense<0.000000e+00> : vector<128x64xf32>
    %29 = tpu.matmul %26, %28, %cst_43 {dimension_numbers = #tpu.dot_dimension_numbers<[1], [0], [0], [1], [0, 0, 1, 1], [], []>} : vector<128x8xbf16>, vector<8x64xbf16>, vector<128x64xf32> -> vector<128x64xf32>
    %30 = arith.addf %24, %29 : vector<128x64xf32>
    %c0_44 = arith.constant 0 : index
    %c2 = arith.constant 2 : index
    %c0_45 = arith.constant 0 : index
    %31 = vector.load %arg8[%c0_44, %c2, %c0_45] : memref<10x18x8xbf16, #tpu.memory_space<vmem>>, vector<8x16x8xbf16>
    %32 = vector.shape_cast %31 : vector<8x16x8xbf16> to vector<128x8xbf16>
    %c2_46 = arith.constant 2 : index
    %c0_47 = arith.constant 0 : index
    %c0_48 = arith.constant 0 : index
    %33 = vector.load %arg5[%c2_46, %c0_47, %c0_48] : memref<9x8x64xbf16, #tpu.memory_space<vmem>>, vector<1x8x64xbf16>
    %34 = vector.shape_cast %33 : vector<1x8x64xbf16> to vector<8x64xbf16>
    %cst_49 = arith.constant dense<0.000000e+00> : vector<128x64xf32>
    %35 = tpu.matmul %32, %34, %cst_49 {dimension_numbers = #tpu.dot_dimension_numbers<[1], [0], [0], [1], [0, 0, 1, 1], [], []>} : vector<128x8xbf16>, vector<8x64xbf16>, vector<128x64xf32> -> vector<128x64xf32>
    %36 = arith.addf %30, %35 : vector<128x64xf32>
    %c1_50 = arith.constant 1 : index
    %c0_51 = arith.constant 0 : index
    %c0_52 = arith.constant 0 : index
    %37 = vector.load %arg8[%c1_50, %c0_51, %c0_52] : memref<10x18x8xbf16, #tpu.memory_space<vmem>>, vector<8x16x8xbf16>
    %38 = vector.shape_cast %37 : vector<8x16x8xbf16> to vector<128x8xbf16>
    %c3 = arith.constant 3 : index
    %c0_53 = arith.constant 0 : index
    %c0_54 = arith.constant 0 : index
    %39 = vector.load %arg5[%c3, %c0_53, %c0_54] : memref<9x8x64xbf16, #tpu.memory_space<vmem>>, vector<1x8x64xbf16>
    %40 = vector.shape_cast %39 : vector<1x8x64xbf16> to vector<8x64xbf16>
    %cst_55 = arith.constant dense<0.000000e+00> : vector<128x64xf32>
    %41 = tpu.matmul %38, %40, %cst_55 {dimension_numbers = #tpu.dot_dimension_numbers<[1], [0], [0], [1], [0, 0, 1, 1], [], []>} : vector<128x8xbf16>, vector<8x64xbf16>, vector<128x64xf32> -> vector<128x64xf32>
    %42 = arith.addf %36, %41 : vector<128x64xf32>
    %c1_56 = arith.constant 1 : index
    %c1_57 = arith.constant 1 : index
    %c0_58 = arith.constant 0 : index
    %43 = vector.load %arg8[%c1_56, %c1_57, %c0_58] : memref<10x18x8xbf16, #tpu.memory_space<vmem>>, vector<8x16x8xbf16>
    %44 = vector.shape_cast %43 : vector<8x16x8xbf16> to vector<128x8xbf16>
    %c4 = arith.constant 4 : index
    %c0_59 = arith.constant 0 : index
    %c0_60 = arith.constant 0 : index
    %45 = vector.load %arg5[%c4, %c0_59, %c0_60] : memref<9x8x64xbf16, #tpu.memory_space<vmem>>, vector<1x8x64xbf16>
    %46 = vector.shape_cast %45 : vector<1x8x64xbf16> to vector<8x64xbf16>
    %cst_61 = arith.constant dense<0.000000e+00> : vector<128x64xf32>
    %47 = tpu.matmul %44, %46, %cst_61 {dimension_numbers = #tpu.dot_dimension_numbers<[1], [0], [0], [1], [0, 0, 1, 1], [], []>} : vector<128x8xbf16>, vector<8x64xbf16>, vector<128x64xf32> -> vector<128x64xf32>
    %48 = arith.addf %42, %47 : vector<128x64xf32>
    %c1_62 = arith.constant 1 : index
    %c2_63 = arith.constant 2 : index
    %c0_64 = arith.constant 0 : index
    %49 = vector.load %arg8[%c1_62, %c2_63, %c0_64] : memref<10x18x8xbf16, #tpu.memory_space<vmem>>, vector<8x16x8xbf16>
    %50 = vector.shape_cast %49 : vector<8x16x8xbf16> to vector<128x8xbf16>
    %c5 = arith.constant 5 : index
    %c0_65 = arith.constant 0 : index
    %c0_66 = arith.constant 0 : index
    %51 = vector.load %arg5[%c5, %c0_65, %c0_66] : memref<9x8x64xbf16, #tpu.memory_space<vmem>>, vector<1x8x64xbf16>
    %52 = vector.shape_cast %51 : vector<1x8x64xbf16> to vector<8x64xbf16>
    %cst_67 = arith.constant dense<0.000000e+00> : vector<128x64xf32>
    %53 = tpu.matmul %50, %52, %cst_67 {dimension_numbers = #tpu.dot_dimension_numbers<[1], [0], [0], [1], [0, 0, 1, 1], [], []>} : vector<128x8xbf16>, vector<8x64xbf16>, vector<128x64xf32> -> vector<128x64xf32>
    %54 = arith.addf %48, %53 : vector<128x64xf32>
    %c2_68 = arith.constant 2 : index
    %c0_69 = arith.constant 0 : index
    %c0_70 = arith.constant 0 : index
    %55 = vector.load %arg8[%c2_68, %c0_69, %c0_70] : memref<10x18x8xbf16, #tpu.memory_space<vmem>>, vector<8x16x8xbf16>
    %56 = vector.shape_cast %55 : vector<8x16x8xbf16> to vector<128x8xbf16>
    %c6 = arith.constant 6 : index
    %c0_71 = arith.constant 0 : index
    %c0_72 = arith.constant 0 : index
    %57 = vector.load %arg5[%c6, %c0_71, %c0_72] : memref<9x8x64xbf16, #tpu.memory_space<vmem>>, vector<1x8x64xbf16>
    %58 = vector.shape_cast %57 : vector<1x8x64xbf16> to vector<8x64xbf16>
    %cst_73 = arith.constant dense<0.000000e+00> : vector<128x64xf32>
    %59 = tpu.matmul %56, %58, %cst_73 {dimension_numbers = #tpu.dot_dimension_numbers<[1], [0], [0], [1], [0, 0, 1, 1], [], []>} : vector<128x8xbf16>, vector<8x64xbf16>, vector<128x64xf32> -> vector<128x64xf32>
    %60 = arith.addf %54, %59 : vector<128x64xf32>
    %c2_74 = arith.constant 2 : index
    %c1_75 = arith.constant 1 : index
    %c0_76 = arith.constant 0 : index
    %61 = vector.load %arg8[%c2_74, %c1_75, %c0_76] : memref<10x18x8xbf16, #tpu.memory_space<vmem>>, vector<8x16x8xbf16>
    %62 = vector.shape_cast %61 : vector<8x16x8xbf16> to vector<128x8xbf16>
    %c7 = arith.constant 7 : index
    %c0_77 = arith.constant 0 : index
    %c0_78 = arith.constant 0 : index
    %63 = vector.load %arg5[%c7, %c0_77, %c0_78] : memref<9x8x64xbf16, #tpu.memory_space<vmem>>, vector<1x8x64xbf16>
    %64 = vector.shape_cast %63 : vector<1x8x64xbf16> to vector<8x64xbf16>
    %cst_79 = arith.constant dense<0.000000e+00> : vector<128x64xf32>
    %65 = tpu.matmul %62, %64, %cst_79 {dimension_numbers = #tpu.dot_dimension_numbers<[1], [0], [0], [1], [0, 0, 1, 1], [], []>} : vector<128x8xbf16>, vector<8x64xbf16>, vector<128x64xf32> -> vector<128x64xf32>
    %66 = arith.addf %60, %65 : vector<128x64xf32>
    %c2_80 = arith.constant 2 : index
    %c2_81 = arith.constant 2 : index
    %c0_82 = arith.constant 0 : index
    %67 = vector.load %arg8[%c2_80, %c2_81, %c0_82] : memref<10x18x8xbf16, #tpu.memory_space<vmem>>, vector<8x16x8xbf16>
    %68 = vector.shape_cast %67 : vector<8x16x8xbf16> to vector<128x8xbf16>
    %c8 = arith.constant 8 : index
    %c0_83 = arith.constant 0 : index
    %c0_84 = arith.constant 0 : index
    %69 = vector.load %arg5[%c8, %c0_83, %c0_84] : memref<9x8x64xbf16, #tpu.memory_space<vmem>>, vector<1x8x64xbf16>
    %70 = vector.shape_cast %69 : vector<1x8x64xbf16> to vector<8x64xbf16>
    %cst_85 = arith.constant dense<0.000000e+00> : vector<128x64xf32>
    %71 = tpu.matmul %68, %70, %cst_85 {dimension_numbers = #tpu.dot_dimension_numbers<[1], [0], [0], [1], [0, 0, 1, 1], [], []>} : vector<128x8xbf16>, vector<8x64xbf16>, vector<128x64xf32> -> vector<128x64xf32>
    %72 = arith.addf %66, %71 : vector<128x64xf32>
    %73 = vector.broadcast %17 : vector<1x64xf32> to vector<128x64xf32>
    %74 = arith.addf %72, %73 : vector<128x64xf32>
    %75 = arith.truncf %74 : vector<128x64xf32> to vector<128x64xbf16>
    %76 = vector.shape_cast %75 : vector<128x64xbf16> to vector<8x16x64xbf16>
    %c0_86 = arith.constant 0 : index
    %c0_87 = arith.constant 0 : index
    %c0_88 = arith.constant 0 : index
    %c0_89 = arith.constant 0 : index
    %c0_90 = arith.constant 0 : index
    %77 = vector.load %arg7[%c0_86, %c0_87, %c0_88, %c0_89, %c0_90] : memref<1x1x8x16x64xbf16, #tpu.memory_space<vmem>>, vector<1x1x8x16x64xbf16>
    %78 = vector.shape_cast %77 : vector<1x1x8x16x64xbf16> to vector<8x16x64xbf16>
    %79 = vector.shape_cast %76 : vector<8x16x64xbf16> to vector<1x1x8x16x64xbf16>
    tpu.vector_store %arg7[%c0_86, %c0_87, %c0_88, %c0_89, %c0_90], %79 {strides = array<i32>} : memref<1x1x8x16x64xbf16, #tpu.memory_space<vmem>>, vector<1x1x8x16x64xbf16>,
    return
  }
  func.func @transform_0(%arg0: i32, %arg1: i32) -> (i32, i32, i32, i32, i32) {
    %c0_i32 = arith.constant 0 : i32
    %c0_i32_0 = arith.constant 0 : i32
    %c0_i32_1 = arith.constant 0 : i32
    %c0_i32_2 = arith.constant 0 : i32
    return %arg0, %arg1, %c0_i32, %c0_i32_0, %c0_i32_1 : i32, i32, i32, i32, i32
  }
  func.func @transform_1(%arg0: i32, %arg1: i32) -> (i32, i32, i32, i32, i32) {
    %c1_i32 = arith.constant 1 : i32
    %0 = arith.subi %arg1, %c1_i32 : i32
    %c0_i32 = arith.constant 0 : i32
    %1 = arith.maxsi %0, %c0_i32 : i32
    %c7_i32 = arith.constant 7 : i32
    %c0_i32_0 = arith.constant 0 : i32
    %c0_i32_1 = arith.constant 0 : i32
    %c0_i32_2 = arith.constant 0 : i32
    return %arg0, %1, %c7_i32, %c0_i32_0, %c0_i32_1 : i32, i32, i32, i32, i32
  }
  func.func @transform_2(%arg0: i32, %arg1: i32) -> (i32, i32, i32, i32, i32) {
    %c1_i32 = arith.constant 1 : i32
    %0 = arith.addi %arg1, %c1_i32 : i32
    %c1_i32_0 = arith.constant 1 : i32
    %1 = arith.minsi %0, %c1_i32_0 : i32
    %c0_i32 = arith.constant 0 : i32
    %c0_i32_1 = arith.constant 0 : i32
    %c0_i32_2 = arith.constant 0 : i32
    %c0_i32_3 = arith.constant 0 : i32
    return %arg0, %1, %c0_i32, %c0_i32_1, %c0_i32_2 : i32, i32, i32, i32, i32
  }
  func.func @transform_3(%arg0: i32, %arg1: i32) -> (i32, i32, i32) {
    %c0_i32 = arith.constant 0 : i32
    %c0_i32_0 = arith.constant 0 : i32
    %c0_i32_1 = arith.constant 0 : i32
    %c0_i32_2 = arith.constant 0 : i32
    return %c0_i32, %c0_i32_0, %c0_i32_1 : i32, i32, i32
  }
  func.func @transform_4(%arg0: i32, %arg1: i32) -> (i32, i32) {
    %c0_i32 = arith.constant 0 : i32
    %c0_i32_0 = arith.constant 0 : i32
    %c0_i32_1 = arith.constant 0 : i32
    return %c0_i32, %c0_i32_0 : i32, i32
  }
  func.func @transform_5(%arg0: i32, %arg1: i32) -> (i32, i32, i32, i32, i32) {
    %c0_i32 = arith.constant 0 : i32
    %c0_i32_0 = arith.constant 0 : i32
    %c0_i32_1 = arith.constant 0 : i32
    %c0_i32_2 = arith.constant 0 : i32
    return %arg0, %arg1, %c0_i32, %c0_i32_0, %c0_i32_1 : i32, i32, i32, i32, i32
  }
}

</mosaic_0001>

<bundles_post_ra>
// kernel: tpu_custom_call.1
= control target key start
LH: loop header
LB: loop body
LE: loop exit
PB: predicated region body
PF: predicated region fallthrough
CT: control target
= control target key end

     0   :  { %10 = vsyncpa [#allocation4], 0  ;;  %s5559_s0 = inlined_call_operand.vmem [shape: bf16[2,2,8,16,8], index: 0, kind: input, shape index: {}]   ;;  %s5560_s1 = inlined_call_operand.vmem [shape: bf16[2,2,8,16,8], index: 1, kind: input, shape index: {}]   ;;  %s5561_s2 = inlined_call_operand.vmem [shape: bf16[2,2,8,16,8], index: 2, kind: input, shape index: {}]   ;;  %s5562_s3 = inlined_call_operand.vmem [shape: bf16[9,8,64], index: 3, kind: input, shape index: {}]   ;;  %s5563_s4 = inlined_call_operand.vmem [shape: f32[1,64], index: 4, kind: input, shape index: {}]   ;;  %s5564_s5 = inlined_call_operand.hbm [shape: bf16[2,2,8,16,64], index: 5, kind: output, shape index: {}]  }
   0x1   :  { %12 = vsyncpa [#allocation4 + $0x1], 0  ;;  %s4292_s18 = smov 0   ;;  %s4294_s19 = smov 0  }
   0x2   :  { %s4296_s20 = smov 0   ;;  %s4298_s21 = smov 0  }
   0x3   :  { %s4300_s22 = smov 0   ;;  %s4302_s23 = smov 0  }
   0x4   :  { %s4304_s24 = smov 0   ;;  %s4306_s25 = smov 0  }
   0x5 LB: > { %s3443_s26 = sadd.s32 4294967295, %s4257_s25   ;;  %s3444_s27 = sadd.s32 4294967294, %s4257_s25   ;;  %s4257_s25 = sphi %s4306_s25, %s18_s25   ;;  %s4253_s24 = sphi %s4304_s24, %s5618_s24   ;;  %s4249_s23 = sphi %s4302_s23, %s5617_s23   ;;  %s4245_s22 = sphi %s4300_s22, %s5616_s22   ;;  %s4241_s21 = sphi %s4298_s21, %s5615_s21   ;;  %s4237_s20 = sphi %s4296_s20, %s5614_s20   ;;  %s4233_s19 = sphi %s4294_s19, %s5613_s19   ;;  %s4229_s18 = sphi %s4292_s18, %s5612_s18  }
   0x6   : > { %s27_s28 = sadd.s32 1, %s4249_s23  ;;  %s30_s29 = sadd.s32 1, %s4253_s24 }
   0x7   : > { %p28_p0 = scmp.ge.s32.totalorder %s27_s28, 2  ;;  %p187_p1 = scmp.ne.s32.totalorder %s4237_s20, %s4233_s19 }
   0x8   : > { %p188_p2 = scmp.eq.s32.totalorder %s3443_s26, 3  ;;  %p193_p5 = scmp.ne.s32.totalorder %s4233_s19, %s4229_s18 }
   0x9   : > { %s5620_s28 = smov (%p28_p0, %s27_s28), 0  ;;  %s5622_s29 = smov (!%p28_p0, %s30_s29), %s4253_s24 }
   0xa   : > { %s173_s30 = ssub.s32 %s4249_s23, %s5620_s28  ;;  %p4343_p3 = por %p188_p2, %p187_p1 }
   0xb   : > { %p32_p4 = scmp.ge.s32.totalorder %s5622_s29, 2  ;;  %p194_p6 = scmp.eq.s32.totalorder %s3444_s27, 3 }
   0xc   : > { %p3449_p7 = scmp.ge.s32.totalorder %s4257_s25, 1  ;;  %p267_p9 = scmp.lt.s32.totalorder %s4257_s25, 5 }
   0xd   : > { %s5624_s29 = smov (%p32_p4, %s5622_s29), 0  ;;  %p4352_p8 = por %p194_p6, %p193_p5 }
   0xe   : > { %s172_s8 = ssub.s32 %s4253_s24, %s5624_s29  ;;  %s177_s9 = sadd.s32 1, %s4237_s20 }
   0xf   : > { %s174_s10 = sor.u32 %s173_s30, %s172_s8  ;;  %p268_p10 = pnand %p3449_p7, %p267_p9 }
  0x10   : > { %p175_p11 = scmp.eq.s32.totalorder %s174_s10, 0 }
  0x11   : > { %271 = sbr.rel (%p268_p10) target bundleno = 494 (0x1ee), region = 40 }
  0x12   : > { %s4361_s11 = scalar_select %p175_p11, %s4237_s20, %s177_s9  }
  0x18   : > { %vm1011_vm0 = vcmask 1043456   ;;  %v3546_v0 = vld [vmem:[%s5562_s3 + $0x10] sm:$0xf]  ;;  %v3471_v1 = vld [vmem:[%s5562_s3 + $0x4] sm:$0xf]  ;;  %p324_p12 = scmp.lt.s32.totalorder %s4245_s22, 1 }
  0x19   : > { %4065 = vmatprep.subr.msk.bf16.mxu0 %vm1011_vm0, %v3546_v0  ;;  %v4372_v2 = vsel %vm1011_vm0, %v3546_v0, 0  ;;  %4061 = vmatprep.subr.msk.bf16.mxu1 %vm1011_vm0, %v3471_v1  ;;  %p326_p13 = scmp.lt.s32.totalorder %s4241_s21, 1  ;;  %v1013_v3 = vsel %vm1011_vm0, %v3471_v1, 0  ;;  %s4383_s27 = sadd.s32 4294967295, %s4241_s21  ;;  %vm397_vm1 = vsmask.f32 256 }
  0x1a   : > { %3842 = vmatpush3.bf16.msra.mxu0 %v4372_v2  ;;  %s325_s16 = scalar_select %p324_p12, %s4245_s22, 1  ;;  %3770 = vmatpush3.bf16.msra.mxu1 %v1013_v3  ;;  %vm398_vm2 = vsmask.f32 4368  ;;  %v4391_v4 = vld [vmem:[%s5562_s3] sm:$0xf]  ;;  %vm561_vm3 = vcmask 60416  }
  0x1b   : > { %s327_s17 = scalar_select %p326_p13, %s4241_s21, 1  ;;  %v4396_v5 = vld [vmem:[%s5562_s3 + $0x14] sm:$0xf]  ;;  %vm562_vm4 = vsmask.f32 7938  ;;  %vm569_vm5 = vcmask 57344   ;;  %4062 = vmatprep.subr.msk.bf16.mxu1 %vm1011_vm0, %v4391_v4  ;;  %vm4414_vm6 = vmor %vm397_vm1, %vm398_vm2 }
  0x1c   : > { %s4379_s26 = sshll.u32 %s325_s16, 5  ;;  %p334_p0 = scmp.gt.s32.totalorder %s4383_s27, 0  ;;  %4067 = vmatprep.subr.msk.bf16.mxu0 %vm1011_vm0, %v4396_v5  ;;  %v564_v15 = vld [vmem:[#allocation2 + $0xc] sm:$0xf]  ;;  %vm4423_vm7 = vmand %vm561_vm3, %vm562_vm4  ;;  %v571_v25 = vld [vmem:[#allocation2 + $0x14] sm:$0x1] }
  0x1d   : > { %s3451_s30 = sshll.u32 %s327_s17, 4  ;;  %p3455_p1 = scmp.lt.s32.totalorder %s4383_s27, 1  ;;  %vm4434_vm8 = vmand %vm569_vm5, %vm397_vm1  ;;  %v574_v33 = vld [vmem:[#allocation2 + $0x18] sm:$0xf]  ;;  %v578_v34 = vld [vmem:[#allocation2 + $0x20] sm:$0x1] }
  0x1e   : > { %s330_s8 = sadd.s32 %s4379_s26, %s3451_s30  ;;  %p385_p2 = scmp.eq.s32.totalorder %s4241_s21, 0  ;;  %v581_v50 = vld [vmem:[#allocation2 + $0x24] sm:$0xf]  ;;  %v4468_v57 = vsel %vm1011_vm0, %v4391_v4, 0  ;;  %vm4474_vm10 = vmand %vm569_vm5, %vm562_vm4  ;;  %vm765_vm11 = vsmask.f32 3328 }
  0x1f   : > { %s3453_s9 = sshll.u32 %s330_s8, 2  ;;  %vm766_vm12 = vsmask.f32 7440  ;;  %vm986_vm13 = vcmask 64512   ;;  %vm1300_vm15 = vcmask 1042432   ;;  %vm1301_vm1 = vcmask 1046532  }
  0x20   : > { %s4401_s17 = scalar_lea.vmem %s5559_s0, %s3453_s9  ;;  %vm4548_vm14 = vmor %vm765_vm11, %vm766_vm12  ;;  %p391_p5 = scmp.eq.s32.totalorder %s4241_s21, 1 }
  0x21   : > { %v365_v6 = vld [vmem:[%s4401_s17] sm:$0xf]  ;;  %v366_v7 = vld [vmem:[%s4401_s17 + $0x4] sm:$0xf]  ;;  %v367_v8 = vld [vmem:[%s4401_s17 + $0x8] sm:$0xf] }
  0x22   : > { %v401_v9 = vshrl.u32 %v365_v6, 16  ;;  %v404_v10 = vshll.u32 %v365_v6, 16  ;;  %v409_v11 = vshrl.u32 %v366_v7, 16  ;;  %v412_v12 = vshll.u32 %v366_v7, 16  ;;  %v368_v13 = vld [vmem:[%s4401_s17 + $0xc] sm:$0xf]  ;;  %vm4677_vm2 = vmor %vm1300_vm15, %vm1301_vm1 }
  0x23   : > { %v418_v16 = vshrl.u32 %v367_v8, 16  ;;  %v421_v17 = vshll.u32 %v367_v8, 16  ;;  %v426_v18 = vshrl.u32 %v368_v13, 16  ;;  %v429_v19 = vshll.u32 %v368_v13, 16  ;;  %s335_s30 = scalar_select %p334_p0, %s4383_s27, 0 }
  0x24   : > { %v403_v20 = vrot.slane %v401_v9, 7  ;;  %v411_v21 = vrot.slane %v409_v11, 7  ;;  %s4429_s8 = scalar_select %p385_p2, 1, 0  ;;  %v369_v23 = vld [vmem:[%s4401_s17 + $0x10] sm:$0xf] }
  0x25   : > { %v420_v26 = vrot.slane %v418_v16, 7  ;;  %v428_v27 = vrot.slane %v426_v18, 7  ;;  %s5626_s30 = smov (!%p3455_p1, %s335_s30), 1  ;;  %v435_v28 = vshrl.u32 %v369_v23, 16  ;;  %v370_v43 = vld [vmem:[%s4401_s17 + $0x14] sm:$0xf] }
  0x26   : > { %v406_v29 = vor.u32 %v404_v10, %v403_v20  ;;  %v407_v30 = vrot.slane %v403_v20, 4  ;;  %v414_v31 = vor.u32 %v412_v12, %v411_v21  ;;  %v416_v32 = vrot.slane %v411_v21, 4  ;;  %s3460_s9 = sshll.u32 %s5626_s30, 4  ;;  %v4450_v44 = vld [vmem:[%s4401_s17 + $0x18] sm:$0xf] }
  0x27   : > { %v423_v35 = vor.u32 %v421_v17, %v420_v26  ;;  %v424_v36 = vrot.slane %v420_v26, 4  ;;  %v431_v37 = vor.u32 %v429_v19, %v428_v27  ;;  %v433_v38 = vrot.slane %v428_v27, 4  ;;  %s3379_s27 = sadd.s32 %s3460_s9, %s4379_s26  ;;  %v643_v13 = vld [vmem:[#allocation2] sm:$0xf]  ;;  %v647_v20 = vld [vmem:[#allocation2 + $0x8] sm:$0x1] }
  0x28   : > { %v415_v39 = vsel %vm4414_vm6, %v407_v30, %v414_v31  ;;  %v565_v40 = vsel %vm4423_vm7, %v406_v29, %v564_v15  ;;  %v572_v41 = vsel %vm4434_vm8, %v416_v32, %v571_v25  ;;  %v387_v42 = vstv %s4429_s8  ;;  %s3462_s10 = sshll.u32 %s3379_s27, 2  ;;  %s3666_s8 = sshll.u32 %s4245_s22, 5 }
  0x29   : > { %566 = vst [vmem:[#allocation2 + $0xc] sm:$0xf] %v565_v40  ;;  %568 = vst.msk [vmem:[#allocation2 + $0x10] sm:$0xf] %vm561_vm3, %v415_v39  ;;  %v432_v45 = vsel %vm4414_vm6, %v424_v36, %v431_v37  ;;  %v575_v46 = vsel %vm4423_vm7, %v423_v35, %v574_v33  ;;  %v579_v47 = vsel %vm4434_vm8, %v433_v38, %v578_v34  ;;  %vm388_vm9 = vcmp.eq.s32.totalorder %v387_v42, 1  ;;  %s3381_s14 = scalar_lea.vmem %s5560_s1, %s3462_s10  ;;  %s349_s10 = sadd.s32 1, %s4241_s21 }
  0x2a   : > { %573 = vst [vmem:[#allocation2 + $0x14] sm:$0x1] %v572_v41  ;;  %576 = vst [vmem:[#allocation2 + $0x18] sm:$0xf] %v575_v46  ;;  %v4463_v48 = vrot.slane %v435_v28, 7  ;;  %v438_v49 = vshll.u32 %v369_v23, 16 }
  0x2b   : > { %577 = vst.msk [vmem:[#allocation2 + $0x1c] sm:$0xf] %vm561_vm3, %v432_v45  ;;  %580 = vst [vmem:[#allocation2 + $0x20] sm:$0x1] %v579_v47  ;;  %v3469_v51 = vld [vmem:[%s3381_s14 + $0x38] sm:$0xf] }
  0x2c   : > { %v3470_v52 = vld [vmem:[%s3381_s14 + $0x3c] sm:$0xf]  ;;  %v443_v53 = vshrl.u32 %v370_v43, 16  ;;  %v452_v54 = vshrl.u32 %v4450_v44, 16  ;;  %v389_v55 = vsel %vm388_vm9, 0, %v3469_v51  ;;  %v440_v58 = vor.u32 %v438_v49, %v4463_v48  ;;  %p4837_p4 = scmp.lt.s32.totalorder %s349_s10, 1 }
  0x2d   : > { %v390_v56 = vsel %vm388_vm9, 0, %v3470_v52  ;;  %v624_v59 = vshrl.u32 %v389_v55, 16  ;;  %v446_v61 = vshll.u32 %v370_v43, 16  ;;  %v455_v62 = vshll.u32 %v4450_v44, 16  ;;  %v4507_v37 = vld [vmem:[%s4401_s17 + $0x1c] sm:$0xf] }
  0x2e   : > { %v632_v60 = vshrl.u32 %v390_v56, 16  ;;  %v627_v0 = vshll.u32 %v389_v55, 16  ;;  %v635_v1 = vshll.u32 %v390_v56, 16  ;;  %v441_v3 = vrot.slane %v4463_v48, 4  ;;  %v588_v48 = vld [vmem:[#allocation2 + $0x30] sm:$0xf] }
  0x2f   : > { %v582_v4 = vsel %vm4423_vm7, %v440_v58, %v581_v50  ;;  %v626_v6 = vrot.slane %v624_v59, 7  ;;  %v4481_v8 = vrot.slane %v443_v53, 7  ;;  %v4483_v9 = vrot.slane %v452_v54, 7  ;;  %s5628_s10 = smov (!%p4837_p4, %s349_s10), 1 }
  0x30   : > { %v634_v7 = vrot.slane %v632_v60, 7  ;;  %583 = vst [vmem:[#allocation2 + $0x24] sm:$0xf] %v582_v4  ;;  %v681_v10 = vld [vmem:[#allocation2 + $0xc] sm:$0x1]  ;;  %v4522_v46 = vsel %vm1011_vm0, %v4396_v5, 0 }
  0x31   : > { %v712_v11 = vld [vmem:[#allocation2 + $0x14] sm:$0x1]  ;;  %v4485_v12 = vld [vmem:[#allocation2 + $0x10] sm:$0xf]  ;;  %v682_v15 = vsel %vm4434_vm8, 0, %v681_v10  ;;  %v629_v26 = vor.u32 %v627_v0, %v626_v6  ;;  %v448_v28 = vor.u32 %v446_v61, %v4481_v8  ;;  %v630_v35 = vrot.slane %v626_v6, 4 }
  0x32   : > { %v713_v16 = vsel %vm4474_vm10, 0, %v712_v11  ;;  %v1757_v17 = vshll.u32 %v4485_v12, 16  ;;  %v1761_v18 = vshrl.u32 %v4485_v12, 16  ;;  %v684_v19 = vld [vmem:[#allocation2 + $0x18] sm:$0x1]  ;;  %v637_v27 = vor.u32 %v635_v1, %v634_v7  ;;  %s5630_s10 = smov (!%p4837_p4, %s5628_s10), 1 }
  0x33   : > { %683 = vst [vmem:[#allocation2 + $0xc] sm:$0x1] %v682_v15  ;;  %714 = vst [vmem:[#allocation2 + $0x14] sm:$0x1] %v713_v16  ;;  %v685_v21 = vsel %vm4434_vm8, 0, %v684_v19  ;;  %v639_v36 = vrot.slane %v634_v7, 4  ;;  %v457_v38 = vor.u32 %v455_v62, %v4483_v9  ;;  %v644_v41 = vsel %vm4423_vm7, %v629_v26, %v643_v13 }
  0x34   : > { %v715_v23 = vld [vmem:[#allocation2 + $0x20] sm:$0x1]  ;;  %v4495_v25 = vld [vmem:[#allocation2 + $0x1c] sm:$0xf]  ;;  %v4498_v29 = vrot.slane %v1757_v17, 5  ;;  %v1763_v30 = vrot.slane %v1761_v18, 4  ;;  %v638_v44 = vsel %vm4414_vm6, %v630_v35, %v637_v27  ;;  %v449_v5 = vsel %vm4414_vm6, %v441_v3, %v448_v28 }
  0x35   : > { %686 = vst [vmem:[#allocation2 + $0x18] sm:$0x1] %v685_v21  ;;  %v716_v31 = vsel %vm4474_vm10, 0, %v715_v23  ;;  %v1781_v32 = vshll.u32 %v4495_v25, 16  ;;  %v4503_v33 = vld [vmem:[#allocation2 + $0x10] sm:$0xf]  ;;  %v648_v45 = vsel %vm4434_vm8, %v639_v36, %v647_v20  ;;  %v589_v60 = vsel %vm4423_vm7, %v457_v38, %v588_v48 }
  0x36   : > { %717 = vst [vmem:[#allocation2 + $0x20] sm:$0x1] %v716_v31  ;;  %v1785_v34 = vshrl.u32 %v4495_v25, 16  ;;  %v1764_v39 = vor.u32 %v1763_v30, %v4498_v29  ;;  %v802_v42 = vshll.u32 %v4503_v33, 16  ;;  %645 = vst [vmem:[#allocation2] sm:$0xf] %v644_v41 }
  0x37   : > { %v4511_v40 = vrot.slane %v1781_v32, 5  ;;  %v687_v47 = vld [vmem:[#allocation2 + $0x24] sm:$0x1]  ;;  %v2146_v50 = vrot.slane %v4495_v25, 5  ;;  %646 = vst.msk [vmem:[#allocation2 + $0x4] sm:$0xf] %vm561_vm3, %v638_v44 }
  0x38   : > { %v1787_v43 = vrot.slane %v1785_v34, 4  ;;  %v4524_v49 = vrot.slane %v1764_v39, 4  ;;  %649 = vst [vmem:[#allocation2 + $0x8] sm:$0x1] %v648_v45  ;;  %v460_v51 = vshrl.u32 %v4507_v37, 16  ;;  %v463_v52 = vshll.u32 %v4507_v37, 16 }
  0x39   : > { %v4531_v54 = vrot.slane %v802_v42, 5  ;;  %v688_v55 = vsel %vm4434_vm8, 0, %v687_v47  ;;  %584 = vst.msk [vmem:[#allocation2 + $0x28] sm:$0xf] %vm561_vm3, %v449_v5  ;;  %v806_v3 = vshrl.u32 %v4503_v33, 16  ;;  %v450_v27 = vrot.slane %v4481_v8, 4 }
  0x3a   : > { %v1788_v53 = vor.u32 %v1787_v43, %v4511_v40  ;;  %v1723_v56 = vld [vmem:[#allocation2 + $0xc] sm:$0xf]  ;;  %v4537_v58 = vld [vmem:[#allocation2 + $0x14] sm:$0x1]  ;;  %689 = vst [vmem:[#allocation2 + $0x24] sm:$0x1] %v688_v55 }
  0x3b   : > { %v4539_v59 = vld [vmem:[#allocation2 + $0xc] sm:$0xf]  ;;  %v1748_v61 = vshrl.u32 %v1723_v56, 16  ;;  %v1751_v62 = vshll.u32 %v1723_v56, 16  ;;  %v1767_v0 = vshll.u32 %v4537_v58, 16  ;;  %v808_v44 = vrot.slane %v806_v3, 4 }
  0x3c   : > { %v1726_v1 = vld [vmem:[#allocation2 + $0x18] sm:$0xf]  ;;  %590 = vst [vmem:[#allocation2 + $0x30] sm:$0xf] %v589_v60  ;;  %v1789_v11 = vrot.slane %v1788_v53, 4  ;;  %v793_v13 = vshrl.u32 %v4539_v59, 16 }
  0x3d   : > { %v4552_v6 = vld [vmem:[#allocation2 + $0x20] sm:$0x1]  ;;  %v1772_v7 = vshrl.u32 %v1726_v1, 16  ;;  %v1775_v10 = vshll.u32 %v1726_v1, 16  ;;  %v1750_v15 = vrot.slane %v1748_v61, 4  ;;  %v1753_v16 = vrot.slane %v1751_v62, 5 }
  0x3e   : > { %v1769_v17 = vrot.slane %v1767_v0, 5  ;;  %v1791_v18 = vshll.u32 %v4552_v6, 16  ;;  %v4556_v19 = vld [vmem:[#allocation2 + $0x14] sm:$0x1]  ;;  %v678_v23 = vld [vmem:[#allocation2] sm:$0x1]  ;;  %v809_v60 = vor.u32 %v808_v44, %v4531_v54 }
  0x3f   : > { %v1774_v20 = vrot.slane %v1772_v7, 4  ;;  %v1777_v21 = vrot.slane %v1775_v10, 5  ;;  %v795_v26 = vrot.slane %v793_v13, 4  ;;  %v1754_v28 = vor.u32 %v1753_v16, %v1750_v15  ;;  %v709_v34 = vld [vmem:[#allocation2 + $0x8] sm:$0x1]  ;;  %s4921_s12 = sshll.u32 %s5630_s10, 4 }
  0x40   : > { %v1770_v30 = vsel %vm4548_vm14, %v4524_v49, %v1769_v17  ;;  %v1793_v31 = vrot.slane %v1791_v18, 5  ;;  %v679_v32 = vsel %vm4434_vm8, 0, %v678_v23  ;;  %v4564_v35 = vld [vmem:[#allocation2 + $0x4] sm:$0xf]  ;;  %v710_v38 = vsel %vm4474_vm10, 0, %v709_v34  ;;  %s358_s14 = sadd.s32 %s4921_s12, %s4379_s26 }
  0x41   : > { %v1778_v36 = vor.u32 %v1777_v21, %v1774_v20  ;;  %680 = vst [vmem:[#allocation2] sm:$0x1] %v679_v32  ;;  %v778_v39 = vshll.u32 %v4564_v35, 16  ;;  %v782_v8 = vshrl.u32 %v4564_v35, 16  ;;  %v1755_v41 = vrot.slane %v1754_v28, 4  ;;  %s3468_s26 = sshll.u32 %s358_s14, 2 }
  0x42   : > { %v1794_v42 = vsel %vm4548_vm14, %v1789_v11, %v1793_v31  ;;  %711 = vst [vmem:[#allocation2 + $0x8] sm:$0x1] %v710_v38  ;;  %v796_v43 = vshll.u32 %v4539_v59, 16  ;;  %v812_v49 = vshll.u32 %v4556_v19, 16  ;;  %v585_v53 = vld [vmem:[#allocation2 + $0x2c] sm:$0x1]  ;;  %s360_s30 = scalar_lea.vmem %s5561_s2, %s3468_s26 }
  0x43   : > { %v1779_v45 = vrot.slane %v1778_v36, 4  ;;  %v4573_v47 = vrot.slane %v778_v39, 5  ;;  %v784_v48 = vrot.slane %v782_v8, 4  ;;  %v1760_v5 = vsel %vm4548_vm14, %v1755_v41, %v4498_v29  ;;  %v1729_v61 = vld [vmem:[#allocation2 + $0x24] sm:$0xf]  ;;  %s4259_s26 = smov [#allocation3]  }
  0x44   : > { %v2139_v55 = vrot.slane %v4485_v12, 5  ;;  %v798_v56 = vrot.slane %v796_v43, 5  ;;  %v4581_v62 = vld [vmem:[#allocation2 + $0x28] sm:$0xf]  ;;  %v3547_v0 = vcombine.low %v1760_v5, %v1770_v30  ;;  %v814_v7 = vrot.slane %v812_v49, 5 }
  0x45   : > { %v1784_v1 = vsel %vm4548_vm14, %v1779_v45, %v4511_v40  ;;  %v785_v3 = vor.u32 %v784_v48, %v4573_v47  ;;  %v810_v13 = vrot.slane %v809_v60, 4  ;;  %v586_v29 = vsel %vm4434_vm8, %v450_v27, %v585_v53  ;;  %v4592_v15 = vld [vmem:[%s5562_s3 + $0x18] sm:$0xf]  ;;  %v690_v20 = vld [vmem:[#allocation2 + $0x30] sm:$0x1] }
  0x46   : > { %v3548_v10 = vcombine.low %v1784_v1, %v1794_v42  ;;  %v799_v11 = vor.u32 %v798_v56, %v795_v26  ;;  %3843 = vmatprep.mubr.msk.bf16.mxu0 %vm986_vm13, %v3547_v0  ;;  %v4597_v16 = vrot.slane %v2146_v50, 4  ;;  %587 = vst [vmem:[#allocation2 + $0x2c] sm:$0x1] %v586_v29  ;;  %v1796_v40 = vshrl.u32 %v1729_v61, 16  ;;  %v4617_v42 = vld [vmem:[#allocation2 + $0x18] sm:$0xf] }
  0x47   : > { %v1799_v17 = vshll.u32 %v1729_v61, 16  ;;  %v1805_v18 = vshll.u32 %v4581_v62, 16  ;;  %v2142_v21 = vrot.slane %v4537_v58, 5  ;;  %v786_v26 = vrot.slane %v785_v3, 4  ;;  %v592_v48 = vld [vmem:[#allocation2 + $0x38] sm:$0x1] }
  0x48   : > { %3844 = vmatmul.mubr.msk.bf16.vlgmr.msra.gmra.mrb[0].mxu0 %vm986_vm13, %v3548_v10  ;;  %v4602_v23 = vld [vmem:[#allocation2] sm:$0xf]  ;;  %v800_v27 = vrot.slane %v799_v11, 4  ;;  %v1809_v28 = vshrl.u32 %v4581_v62, 16  ;;  %v1798_v34 = vrot.slane %v1796_v40, 4  ;;  %v815_v8 = vsel %vm4548_vm14, %v810_v13, %v814_v7 }
  0x49   : > { %v4605_v30 = vld [vmem:[#allocation2 + $0x8] sm:$0x1]  ;;  %v769_v31 = vshrl.u32 %v4602_v23, 16  ;;  %v772_v32 = vshll.u32 %v4602_v23, 16  ;;  %3860 = vmatpush3.bf16.msra.mxu0 %v4522_v46  ;;  %v1801_v36 = vrot.slane %v1799_v17, 5  ;;  %v458_v41 = vrot.slane %v4483_v9, 4 }
  0x4a   : > { %v788_v38 = vshll.u32 %v4605_v30, 16  ;;  %v805_v39 = vsel %vm4548_vm14, %v800_v27, %v4531_v54  ;;  %4068 = vmatprep.subr.msk.bf16.mxu0 %vm1011_vm0, %v4592_v15  ;;  %v4621_v45 = vrot.slane %v1805_v18, 5  ;;  %v1811_v53 = vrot.slane %v1809_v28, 4  ;;  %v4627_v9 = vld [vmem:[#allocation2 + $0x1c] sm:$0xf] }
  0x4b   : > { %v771_v43 = vrot.slane %v769_v31, 4  ;;  %v774_v46 = vrot.slane %v772_v32, 5  ;;  %v1802_v44 = vor.u32 %v1801_v36, %v1798_v34  ;;  %v462_v54 = vrot.slane %v460_v51, 7  ;;  %v4629_v56 = vld [vmem:[#allocation2 + $0x20] sm:$0x1] }
  0x4c   : > { %v790_v49 = vrot.slane %v788_v38, 5  ;;  %v691_v5 = vsel %vm4434_vm8, 0, %v690_v20  ;;  %v817_v61 = vshrl.u32 %v4617_v42, 16  ;;  %v820_v0 = vshll.u32 %v4617_v42, 16  ;;  %v4633_v1 = vld [vmem:[#allocation2 + $0x24] sm:$0xf] }
  0x4d   : > { %v775_v60 = vor.u32 %v774_v46, %v771_v43  ;;  %692 = vst [vmem:[#allocation2 + $0x30] sm:$0x1] %v691_v5  ;;  %v3473_v3 = vcombine.low %v805_v39, %v815_v8  ;;  %v718_v7 = vld [vmem:[#allocation2 + $0x2c] sm:$0x1]  ;;  %v4635_v51 = vrot.slane %v1802_v44, 4  ;;  %v465_v10 = vor.u32 %v463_v52, %v462_v54 }
  0x4e   : > { %v467_v11 = vrot.slane %v462_v54, 4  ;;  %v791_v29 = vsel %vm4548_vm14, %v786_v26, %v790_v49  ;;  %v719_v40 = vsel %vm4474_vm10, 0, %v718_v7  ;;  %v819_v17 = vrot.slane %v817_v61, 4  ;;  %v4648_v52 = vld [vmem:[#allocation2 + $0x28] sm:$0xf] }
  0x4f   : > { %v776_v13 = vrot.slane %v775_v60, 4  ;;  %720 = vst [vmem:[#allocation2 + $0x2c] sm:$0x1] %v719_v40  ;;  %v1812_v18 = vor.u32 %v1811_v53, %v4621_v45  ;;  %v466_v20 = vsel %vm4414_vm6, %v458_v41, %v465_v10  ;;  %v822_v37 = vrot.slane %v820_v0, 5  ;;  %v2105_v8 = vld [vmem:[#allocation2 + $0xc] sm:$0xe] }
  0x50   : > { %v593_v27 = vsel %vm4434_vm8, %v467_v11, %v592_v48  ;;  %591 = vst.msk [vmem:[#allocation2 + $0x34] sm:$0xf] %vm561_vm3, %v466_v20  ;;  %v826_v28 = vshll.u32 %v4627_v9, 16  ;;  %v830_v31 = vshrl.u32 %v4627_v9, 16  ;;  %v836_v32 = vshll.u32 %v4629_v56, 16 }
  0x51   : > { %v781_v26 = vsel %vm4548_vm14, %v776_v13, %v4573_v47  ;;  %594 = vst [vmem:[#allocation2 + $0x38] sm:$0x1] %v593_v27  ;;  %v823_v36 = vor.u32 %v822_v37, %v819_v17  ;;  %v841_v38 = vshrl.u32 %v4633_v1, 16  ;;  %v844_v39 = vshll.u32 %v4633_v1, 16  ;;  %v4667_v44 = vld [vmem:[%s5562_s3 + $0x8] sm:$0xf] }
  0x52   : > { %v3472_v34 = vcombine.low %v781_v26, %v791_v29  ;;  %v1808_v47 = vsel %vm4548_vm14, %v4635_v51, %v4621_v45  ;;  %v828_v41 = vrot.slane %v826_v28, 5  ;;  %v832_v43 = vrot.slane %v830_v31, 4  ;;  %s4927_s13 = scalar_select %p391_p5, 1, 0  ;;  %v1280_v22 = vld [vmem:[#allocation2 + $0x30] sm:$0xe] }
  0x53   : > { %v850_v46 = vshll.u32 %v4648_v52, 16  ;;  %v824_v49 = vrot.slane %v823_v36, 4  ;;  %v843_v53 = vrot.slane %v841_v38, 4  ;;  %v846_v54 = vrot.slane %v844_v39, 5 }
  0x54   : > { %3771 = vmatprep.mubr.msk.bf16.mxu1 %vm986_vm13, %v3472_v34  ;;  %v1732_v48 = vld [vmem:[#allocation2 + $0x30] sm:$0xf]  ;;  %v854_v5 = vshrl.u32 %v4648_v52, 16  ;;  %v833_v61 = vor.u32 %v832_v43, %v828_v41  ;;  %v838_v7 = vrot.slane %v836_v32, 5  ;;  %v3563_v11 = vrot.slane %v2105_v8, 9 }
  0x55   : > { %3772 = vmatmul.mubr.msk.bf16.vlgmr.msra.gmra.mrb[0].mxu1 %vm986_vm13, %v3473_v3  ;;  %v1820_v45 = vshrl.u32 %v1732_v48, 16  ;;  %v1823_v60 = vshll.u32 %v1732_v48, 16  ;;  %v852_v0 = vrot.slane %v850_v46, 5  ;;  %v847_v51 = vor.u32 %v846_v54, %v843_v53  ;;  %v2106_v46 = vld [vmem:[#allocation2 + $0x18] sm:$0xe] }
  0x56   : > { %3788 = vmatpush3.bf16.msra.mxu1 %v4468_v57  ;;  %v856_v10 = vrot.slane %v854_v5, 4  ;;  %v4673_v13 = vld [vmem:[#allocation2 + $0x2c] sm:$0x1]  ;;  %v1813_v29 = vrot.slane %v1812_v18, 4  ;;  %v834_v20 = vrot.slane %v833_v61, 4  ;;  %v829_v18 = vsel %vm4548_vm14, %v824_v49, %v828_v41 }
  0x57   : > { %v1822_v40 = vrot.slane %v1820_v45, 4  ;;  %v1825_v17 = vrot.slane %v1823_v60, 5  ;;  %4063 = vmatprep.subr.msk.bf16.mxu1 %vm1011_vm0, %v4667_v44  ;;  %v1815_v57 = vshll.u32 %v4673_v13, 16  ;;  %v4684_v37 = vld [vmem:[#allocation2 + $0x34] sm:$0xf]  ;;  %v2141_v28 = vrot.slane %v2139_v55, 4 }
  0x58   : > { %v721_v27 = vld [vmem:[#allocation2 + $0x38] sm:$0x1]  ;;  %v857_v26 = vor.u32 %v856_v10, %v852_v0  ;;  %v1829_v34 = vshll.u32 %v4684_v37, 16  ;;  %v1833_v36 = vshrl.u32 %v4684_v37, 16  ;;  %v4694_v38 = vld [vmem:[#allocation2 + $0x2c] sm:$0x1]  ;;  %v839_v8 = vsel %vm4548_vm14, %v834_v20, %v838_v7 }
  0x59   : > { %v722_v31 = vsel %vm4474_vm10, 0, %v721_v27  ;;  %v1826_v32 = vor.u32 %v1825_v17, %v1822_v40  ;;  %v1817_v39 = vrot.slane %v1815_v57, 5  ;;  %v848_v41 = vrot.slane %v847_v51, 4  ;;  %v4708_v5 = vld [vmem:[#allocation2 + $0x30] sm:$0xf] }
  0x5a   : > { %723 = vst [vmem:[#allocation2 + $0x38] sm:$0x1] %v722_v31  ;;  %v4702_v43 = vsel %vm4677_vm2, %v3563_v11, %v2139_v55  ;;  %v4706_v49 = vrot.slane %v1829_v34, 5  ;;  %v1835_v53 = vrot.slane %v1833_v36, 4  ;;  %v3474_v54 = vcombine.low %v829_v18, %v839_v8  ;;  %v4719_v61 = vld [vmem:[#allocation2 + $0x34] sm:$0xf] }
  0x5b   : > { %v4704_v48 = vrot.slane %v1826_v32, 4  ;;  %v1818_v45 = vsel %vm4548_vm14, %v1813_v29, %v1817_v39  ;;  %v858_v60 = vrot.slane %v857_v26, 4  ;;  %v860_v12 = vshll.u32 %v4694_v38, 16  ;;  %v373_v29 = vld [vmem:[%s4401_s17 + $0x20] sm:$0xf] }
  0x5c   : > { %v4717_v55 = vsel %vm4677_vm2, %v2141_v28, %v2142_v21  ;;  %v2149_v7 = vrot.slane %v4552_v6, 5  ;;  %v3549_v51 = vcombine.low %v1808_v47, %v1818_v45  ;;  %v1836_v10 = vor.u32 %v1835_v53, %v4706_v49  ;;  %3775 = vmatprep.mubr.msk.bf16.mxu1 %vm986_vm13, %v3474_v54  ;;  %v2107_v45 = vld [vmem:[#allocation2 + $0x24] sm:$0xe] }
  0x5d   : > { %v3564_v11 = vrot.slane %v2106_v46, 9  ;;  %v1832_v58 = vsel %vm4548_vm14, %v4704_v48, %v4706_v49  ;;  %v853_v21 = vsel %vm4548_vm14, %v848_v41, %v852_v0  ;;  %v862_v40 = vrot.slane %v860_v12, 5  ;;  %v374_v0 = vld [vmem:[%s4401_s17 + $0x24] sm:$0xf] }
  0x5e   : > { %v865_v17 = vshrl.u32 %v4708_v5, 16  ;;  %3847 = vmatprep.mubr.msk.bf16.mxu0 %vm986_vm13, %v3549_v51  ;;  %v1837_v6 = vrot.slane %v1836_v10, 4  ;;  %v3572_v47 = vcombine.low %v4702_v43, %v4717_v55  ;;  %v868_v20 = vshll.u32 %v4708_v5, 16  ;;  %v595_v51 = vld [vmem:[#allocation2 + $0x3c] sm:$0xf] }
  0x5f   : > { %v874_v57 = vshll.u32 %v4719_v61, 16  ;;  %v863_v27 = vsel %vm4548_vm14, %v858_v60, %v862_v40  ;;  %v878_v26 = vshrl.u32 %v4719_v61, 16  ;;  %v469_v28 = vshrl.u32 %v373_v29, 16  ;;  %v599_v10 = vld [vmem:[#allocation2 + $0x44] sm:$0x1] }
  0x60   : > { %v867_v18 = vrot.slane %v865_v17, 4  ;;  %v3475_v32 = vcombine.low %v853_v21, %v863_v27  ;;  %v4747_v34 = vsel %vm4677_vm2, %v3564_v11, %v2146_v50  ;;  %v870_v39 = vrot.slane %v868_v20, 5 }
  0x61   : > { %v4741_v31 = vld [vmem:[#allocation2 + $0x38] sm:$0x1]  ;;  %v876_v8 = vrot.slane %v874_v57, 5  ;;  %v880_v43 = vrot.slane %v878_v26, 4  ;;  %v471_v48 = vrot.slane %v469_v28, 7  ;;  %v472_v53 = vshll.u32 %v373_v29, 16 }
  0x62   : > { %v4749_v36 = vld [vmem:[#allocation2 + $0x38] sm:$0x1]  ;;  %v1839_v41 = vshll.u32 %v4741_v31, 16  ;;  %3776 = vmatmul.mubr.msk.bf16.gmra.mrb[4].mxu1 %vm986_vm13, %v3475_v32  ;;  %v871_v49 = vor.u32 %v870_v39, %v867_v18  ;;  %v477_v25 = vshrl.u32 %v374_v0, 16  ;;  %v480_v54 = vshll.u32 %v374_v0, 16 }
  0x63   : > { %v884_v46 = vshll.u32 %v4749_v36, 16  ;;  %v4757_v60 = vsel %vm4677_vm2, %v4597_v16, %v2149_v7  ;;  %v881_v12 = vor.u32 %v880_v43, %v876_v8  ;;  %v474_v21 = vor.u32 %v472_v53, %v471_v48  ;;  %v375_v29 = vld [vmem:[%s4401_s17 + $0x28] sm:$0xf]  ;;  %v2108_v26 = vld [vmem:[#allocation2 + $0x30] sm:$0xe] }
  0x64   : > { %v1841_v50 = vrot.slane %v1839_v41, 5  ;;  %v872_v11 = vrot.slane %v871_v49, 4  ;;  %v475_v40 = vrot.slane %v471_v48, 4  ;;  %v479_v17 = vrot.slane %v477_v25, 7  ;;  %v376_v16 = vld [vmem:[%s4401_s17 + $0x2c] sm:$0xf] }
  0x65   : > { %v886_v55 = vrot.slane %v884_v46, 5  ;;  %v882_v57 = vrot.slane %v881_v12, 4  ;;  %v3565_v27 = vrot.slane %v2107_v45, 9  ;;  %v2153_v18 = vrot.slane %v4581_v62, 5  ;;  %v377_v62 = vld [vmem:[%s4401_s17 + $0x30] sm:$0xf] }
  0x66   : > { %v1842_v20 = vsel %vm4548_vm14, %v1837_v6, %v1841_v50  ;;  %v877_v0 = vsel %vm4548_vm14, %v872_v11, %v876_v8  ;;  %v482_v28 = vor.u32 %v480_v54, %v479_v17  ;;  %v484_v32 = vrot.slane %v479_v17, 4  ;;  %v4780_v48 = vld [vmem:[%s4401_s17 + $0x34] sm:$0xf]  ;;  %v602_v11 = vld [vmem:[#allocation2 + $0x48] sm:$0xf] }
  0x67   : > { %v3550_v7 = vcombine.low %v1832_v58, %v1842_v20  ;;  %v3573_v39 = vcombine.low %v4747_v34, %v4757_v60  ;;  %v887_v41 = vsel %vm4548_vm14, %v882_v57, %v886_v55  ;;  %v596_v6 = vsel %vm4423_vm7, %v474_v21, %v595_v51 }
  0x68   : > { %v2155_v43 = vrot.slane %v2153_v18, 4  ;;  %v3476_v46 = vcombine.low %v877_v0, %v887_v41  ;;  %v483_v58 = vsel %vm4414_vm6, %v475_v40, %v482_v28  ;;  %597 = vst [vmem:[#allocation2 + $0x3c] sm:$0xf] %v596_v6  ;;  %v600_v8 = vsel %vm4434_vm8, %v484_v32, %v599_v10  ;;  %v613_v6 = vld [vmem:[#allocation2 + $0x5c] sm:$0x1] }
  0x69   : > { %3848 = vmatmul.mubr.msk.bf16.gmra.mrb[4].mxu0 %vm986_vm13, %v3550_v7  ;;  %v2156_v34 = vrot.slane %v4673_v13, 5  ;;  %598 = vst.msk [vmem:[#allocation2 + $0x40] sm:$0xf] %vm561_vm3, %v483_v58  ;;  %601 = vst [vmem:[#allocation2 + $0x44] sm:$0x1] %v600_v8  ;;  %v2154_v49 = vsel %vm4677_vm2, %v3565_v27, %v2153_v18  ;;  %v3566_v53 = vrot.slane %v2108_v26, 9 }
  0x6a   : > { %3861 = vmatprep.mubr.msk.bf16.mxu0 %vm986_vm13, %v3572_v47  ;;  %v2160_v25 = vrot.slane %v4684_v37, 5  ;;  %v486_v54 = vshrl.u32 %v375_v29, 16  ;;  %3779 = vmatprep.mubr.msk.bf16.mxu1 %vm986_vm13, %v3476_v46  ;;  %v489_v13 = vshll.u32 %v375_v29, 16  ;;  %v494_v50 = vshrl.u32 %v376_v16, 16  ;;  %v609_v27 = vld [vmem:[#allocation2 + $0x54] sm:$0xf] }
  0x6b   : > { %v2157_v45 = vsel %vm4677_vm2, %v2155_v43, %v2156_v34  ;;  %v497_v60 = vshll.u32 %v376_v16, 16  ;;  %v2443_v47 = vsel %vm1011_vm0, %v4592_v15, 0  ;;  %v2163_v55 = vrot.slane %v4741_v31, 5  ;;  %v606_v15 = vld [vmem:[#allocation2 + $0x50] sm:$0x1] }
  0x6c   : > { %v2162_v12 = vrot.slane %v2160_v25, 4  ;;  %v488_v51 = vrot.slane %v486_v54, 7  ;;  %v496_v10 = vrot.slane %v494_v50, 7  ;;  %v503_v37 = vshrl.u32 %v377_v62, 16  ;;  %v379_v7 = vld [vmem:[%s4401_s17 + $0x38] sm:$0xf] }
  0x6d   : > { %v506_v21 = vshll.u32 %v377_v62, 16  ;;  %v511_v40 = vshrl.u32 %v4780_v48, 16  ;;  %v3574_v17 = vcombine.low %v2154_v49, %v2157_v45  ;;  %v4796_v29 = vsel %vm4677_vm2, %v3566_v53, %v2160_v25  ;;  %v380_v62 = vld [vmem:[%s4401_s17 + $0x3c] sm:$0xf] }
  0x6e   : > { %v491_v20 = vor.u32 %v489_v13, %v488_v51  ;;  %v492_v57 = vrot.slane %v488_v51, 4  ;;  %v499_v31 = vor.u32 %v497_v60, %v496_v10  ;;  %v501_v18 = vrot.slane %v496_v10, 4  ;;  %v4810_v46 = vld [vmem:[%s5562_s3 + $0x1c] sm:$0xf] }
  0x6f   : > { %v505_v26 = vrot.slane %v503_v37, 7  ;;  %v514_v16 = vshll.u32 %v4780_v48, 16  ;;  %v693_v0 = vld [vmem:[#allocation2 + $0x3c] sm:$0x1]  ;;  %v2164_v28 = vsel %vm4677_vm2, %v2162_v12, %v2163_v55  ;;  %v513_v41 = vrot.slane %v511_v40, 7 }
  0x70   : > { %v603_v32 = vsel %vm4423_vm7, %v491_v20, %v602_v11  ;;  %v3489_v43 = vcombine.low %v4539_v59, %v4503_v33  ;;  %v694_v58 = vsel %vm4434_vm8, 0, %v693_v0  ;;  %v724_v8 = vld [vmem:[#allocation2 + $0x44] sm:$0x1]  ;;  %v4816_v34 = vld [vmem:[#allocation2 + $0x40] sm:$0xf]  ;;  %v500_v48 = vsel %vm4414_vm6, %v492_v57, %v499_v31 }
  0x71   : > { %3862 = vmatmul.mubr.msk.bf16.vlgmr.msra.gmra.mrb[0].mxu0 %vm986_vm13, %v3573_v39  ;;  %604 = vst [vmem:[#allocation2 + $0x48] sm:$0xf] %v603_v32  ;;  %v607_v49 = vsel %vm4434_vm8, %v501_v18, %v606_v15  ;;  %v508_v53 = vor.u32 %v506_v21, %v505_v26  ;;  %695 = vst [vmem:[#allocation2 + $0x3c] sm:$0x1] %v694_v58  ;;  %v725_v25 = vsel %vm4474_vm10, 0, %v724_v8  ;;  %v898_v39 = vshll.u32 %v4816_v34, 16 }
  0x72   : > { %v902_v54 = vshrl.u32 %v4816_v34, 16  ;;  %3878 = vmatpush3.bf16.msra.mxu0 %v2443_v47  ;;  %3865 = vmatprep.mubr.msk.bf16.mxu0 %vm986_vm13, %v3574_v17  ;;  %605 = vst.msk [vmem:[#allocation2 + $0x4c] sm:$0xf] %vm561_vm3, %v500_v48  ;;  %608 = vst [vmem:[#allocation2 + $0x50] sm:$0x1] %v607_v49  ;;  %v509_v45 = vrot.slane %v505_v26, 4  ;;  %v3575_v50 = vcombine.low %v4796_v29, %v2164_v28 }
  0x73   : > { %v4828_v13 = vld [vmem:[#allocation2 + $0x40] sm:$0xf]  ;;  %726 = vst [vmem:[#allocation2 + $0x44] sm:$0x1] %v725_v25  ;;  %v516_v60 = vor.u32 %v514_v16, %v513_v41  ;;  %v518_v12 = vrot.slane %v513_v41, 4  ;;  %v610_v55 = vsel %vm4423_vm7, %v508_v53, %v609_v27  ;;  %4069 = vmatprep.subr.msk.bf16.mxu0 %vm1011_vm0, %v4810_v46  ;;  %v4841_v47 = vrot.slane %v898_v39, 5 }
  0x74   : > { %v904_v51 = vrot.slane %v902_v54, 4  ;;  %611 = vst [vmem:[#allocation2 + $0x54] sm:$0xf] %v610_v55  ;;  %v2167_v10 = vrot.slane %v4828_v13, 5  ;;  %v520_v11 = vshrl.u32 %v379_v7, 16  ;;  %v523_v17 = vshll.u32 %v379_v7, 16 }
  0x75   : > { %v517_v37 = vsel %vm4414_vm6, %v509_v45, %v516_v60  ;;  %v614_v21 = vsel %vm4434_vm8, %v518_v12, %v613_v6  ;;  %v4848_v40 = vld [vmem:[#allocation2 + $0x3c] sm:$0xe]  ;;  %v528_v29 = vshrl.u32 %v380_v62, 16  ;;  %v531_v27 = vshll.u32 %v380_v62, 16  ;;  %v616_v31 = vld [vmem:[#allocation2 + $0x60] sm:$0xf] }
  0x76   : > { %612 = vst.msk [vmem:[#allocation2 + $0x58] sm:$0xf] %vm561_vm3, %v517_v37  ;;  %615 = vst [vmem:[#allocation2 + $0x5c] sm:$0x1] %v614_v21  ;;  %v522_v20 = vrot.slane %v520_v11, 7  ;;  %v905_v57 = vor.u32 %v904_v51, %v4841_v47  ;;  %v3567_v26 = vrot.slane %v4848_v40, 9 }
  0x77   : > { %v530_v15 = vrot.slane %v528_v29, 7  ;;  %v620_v7 = vld [vmem:[#allocation2 + $0x68] sm:$0x1]  ;;  %v2169_v6 = vrot.slane %v2167_v10, 4 }
  0x78   : > { %v696_v18 = vld [vmem:[#allocation2 + $0x48] sm:$0x1]  ;;  %v525_v16 = vor.u32 %v523_v17, %v522_v20  ;;  %v526_v0 = vrot.slane %v522_v20, 4  ;;  %v4859_v28 = vld [vmem:[#allocation2 + $0x3c] sm:$0xf]  ;;  %v906_v25 = vrot.slane %v905_v57, 4 }
  0x79   : > { %3866 = vmatmul.mubr.msk.bf16.gmra.mrb[4].mxu0 %vm986_vm13, %v3575_v50  ;;  %v697_v32 = vsel %vm4434_vm8, 0, %v696_v18  ;;  %v727_v41 = vld [vmem:[#allocation2 + $0x50] sm:$0x1]  ;;  %v533_v62 = vor.u32 %v531_v27, %v530_v15  ;;  %v889_v8 = vshrl.u32 %v4859_v28, 16  ;;  %v892_v48 = vshll.u32 %v4859_v28, 16 }
  0x7a   : > { %v4866_v58 = vld [vmem:[#allocation2 + $0x44] sm:$0x1]  ;;  %698 = vst [vmem:[#allocation2 + $0x48] sm:$0x1] %v697_v32  ;;  %v728_v49 = vsel %vm4474_vm10, 0, %v727_v41  ;;  %v535_v53 = vrot.slane %v530_v15, 4  ;;  %v617_v60 = vsel %vm4423_vm7, %v525_v16, %v616_v31 }
  0x7b   : > { %v908_v39 = vshll.u32 %v4866_v58, 16  ;;  %729 = vst [vmem:[#allocation2 + $0x50] sm:$0x1] %v728_v49  ;;  %v4873_v54 = vld [vmem:[#allocation2 + $0x4c] sm:$0xf]  ;;  %v534_v50 = vsel %vm4414_vm6, %v526_v0, %v533_v62  ;;  %v891_v12 = vrot.slane %v889_v8, 4 }
  0x7c   : > { %v699_v45 = vld [vmem:[#allocation2 + $0x54] sm:$0x1]  ;;  %v894_v55 = vrot.slane %v892_v48, 5  ;;  %v922_v51 = vshll.u32 %v4873_v54, 16  ;;  %v926_v11 = vshrl.u32 %v4873_v54, 16  ;;  %v621_v20 = vsel %vm4434_vm8, %v535_v53, %v620_v7 }
  0x7d   : > { %v1737_v37 = vld [vmem:[#allocation2 + $0x44] sm:$0x1]  ;;  %618 = vst [vmem:[#allocation2 + $0x60] sm:$0xf] %v617_v60  ;;  %619 = vst.msk [vmem:[#allocation2 + $0x64] sm:$0xf] %vm561_vm3, %v534_v50  ;;  %v2168_v48 = vsel %vm4677_vm2, %v3567_v26, %v2167_v10 }
  0x7e   : > { %v910_v21 = vrot.slane %v908_v39, 5  ;;  %v700_v40 = vsel %vm4434_vm8, 0, %v699_v45  ;;  %v730_v17 = vld [vmem:[#allocation2 + $0x5c] sm:$0x1]  ;;  %v4884_v29 = vld [vmem:[#allocation2 + $0x58] sm:$0xf]  ;;  %v895_v57 = vor.u32 %v894_v55, %v891_v12 }
  0x7f   : > { %v4888_v15 = vrot.slane %v922_v51, 5  ;;  %v928_v27 = vrot.slane %v926_v11, 4  ;;  %701 = vst [vmem:[#allocation2 + $0x54] sm:$0x1] %v700_v40  ;;  %v731_v31 = vsel %vm4474_vm10, 0, %v730_v17  ;;  %v946_v16 = vshll.u32 %v4884_v29, 16 }
  0x80   : > { %v2110_v18 = vld [vmem:[#allocation2 + $0x48] sm:$0xe]  ;;  %622 = vst [vmem:[#allocation2 + $0x68] sm:$0x1] %v621_v20  ;;  %732 = vst [vmem:[#allocation2 + $0x5c] sm:$0x1] %v731_v31  ;;  %v911_v62 = vsel %vm4548_vm14, %v906_v25, %v910_v21 }
  0x81   : > { %v950_v0 = vshrl.u32 %v4884_v29, 16  ;;  %v2170_v32 = vrot.slane %v1737_v37, 5  ;;  %v4897_v41 = vld [vmem:[#allocation2 + $0x4c] sm:$0xf]  ;;  %v896_v7 = vrot.slane %v895_v57, 4  ;;  %v929_v8 = vor.u32 %v928_v27, %v4888_v15 }
  0x82   : > { %v4907_v49 = vld [vmem:[#allocation2 + $0x48] sm:$0xf]  ;;  %v4909_v53 = vrot.slane %v946_v16, 5  ;;  %v3568_v50 = vrot.slane %v2110_v18, 9  ;;  %v4916_v60 = vld [vmem:[#allocation2 + $0x50] sm:$0x1] }
  0x83   : > { %v952_v39 = vrot.slane %v950_v0, 4  ;;  %v2171_v45 = vsel %vm4677_vm2, %v2169_v6, %v2170_v32  ;;  %v901_v25 = vsel %vm4548_vm14, %v896_v7, %v4841_v47  ;;  %v913_v13 = vshrl.u32 %v4907_v49, 16  ;;  %v4929_v21 = vld [vmem:[#allocation2 + $0x58] sm:$0xf]  ;;  %v2111_v40 = vld [vmem:[#allocation2 + $0x54] sm:$0xe] }
  0x84   : > { %v916_v10 = vshll.u32 %v4907_v49, 16  ;;  %v2174_v26 = vrot.slane %v4897_v41, 5  ;;  %v3477_v12 = vcombine.low %v901_v25, %v911_v62  ;;  %v932_v6 = vshll.u32 %v4916_v60, 16  ;;  %5588 = vst [vmem:[#allocation6_spill] sm:$0xff] %v4929_v21  ;;  %v4935_v57 = vld [vmem:[#allocation2 + $0x50] sm:$0x1] }
  0x85   : > { %v953_v55 = vor.u32 %v952_v39, %v4909_v53  ;;  %v3576_v51 = vcombine.low %v2168_v48, %v2171_v45  ;;  %v915_v47 = vrot.slane %v913_v13, 4  ;;  %v930_v37 = vrot.slane %v929_v8, 4 }
  0x86   : > { %v918_v11 = vrot.slane %v916_v10, 5  ;;  %3780 = vmatmul.mubr.msk.bf16.gmra.mrb[8].mxu1 %vm986_vm13, %v3477_v12  ;;  %v934_v17 = vrot.slane %v932_v6, 5  ;;  %v4932_v20 = vld [vmem:[#allocation2 + $0x54] sm:$0xf]  ;;  %v2175_v7 = vsel %vm4677_vm2, %v3568_v50, %v2174_v26  ;;  %v2176_v62 = vrot.slane %v2174_v26, 4 }
  0x87   : > { %3869 = vmatprep.mubr.msk.bf16.mxu0 %vm986_vm13, %v3576_v51  ;;  %v4939_v31 = vld [vmem:[#allocation2 + $0x5c] sm:$0x1]  ;;  %v937_v18 = vshrl.u32 %v4932_v20, 16  ;;  %v940_v16 = vshll.u32 %v4932_v20, 16  ;;  %v954_v0 = vrot.slane %v953_v55, 4  ;;  %v2177_v6 = vrot.slane %v4935_v57, 5 }
  0x88   : > { %v919_v27 = vor.u32 %v918_v11, %v915_v47  ;;  %v956_v32 = vshll.u32 %v4939_v31, 16  ;;  %v4946_v8 = vld [vmem:[#allocation2 + $0x5c] sm:$0x1]  ;;  %v733_v48 = vld [vmem:[#allocation2 + $0x68] sm:$0x1]  ;;  %v935_v45 = vsel %vm4548_vm14, %v930_v37, %v934_v17  ;;  %v3569_v55 = vrot.slane %v2111_v40, 9 }
  0x89   : > { %5589 = vst [vmem:[#allocation7_spill] sm:$0xff] %v4946_v8  ;;  %v939_v25 = vrot.slane %v937_v18, 4  ;;  %v942_v13 = vrot.slane %v940_v16, 5  ;;  %v4950_v10 = vld [vmem:[#allocation2 + $0x64] sm:$0xf]  ;;  %v2181_v51 = vrot.slane %v4929_v21, 5  ;;  %v2178_v40 = vsel %vm4677_vm2, %v2176_v62, %v2177_v6 }
  0x8a   : > { %v920_v39 = vrot.slane %v919_v27, 4  ;;  %5590 = vst [vmem:[#allocation8_spill] sm:$0xff] %v4950_v10  ;;  %v958_v12 = vrot.slane %v956_v32, 5  ;;  %v2184_v47 = vrot.slane %v4946_v8, 5  ;;  %v734_v11 = vsel %vm4474_vm10, 0, %v733_v48 }
  0x8b   : > { %v943_v26 = vor.u32 %v942_v13, %v939_v25  ;;  %v1312_v37 = vrot.slane %v4503_v33, 5  ;;  %735 = vst [vmem:[#allocation2 + $0x68] sm:$0x1] %v734_v11  ;;  %v3577_v16 = vcombine.low %v2175_v7, %v2178_v40  ;;  %v2183_v32 = vrot.slane %v2181_v51, 4  ;;  %v1277_v62 = vld [vmem:[#allocation2 + $0xc] sm:$0xe] }
  0x8c   : > { %v925_v50 = vsel %vm4548_vm14, %v920_v39, %v4888_v15  ;;  %v959_v27 = vsel %vm4548_vm14, %v954_v0, %v958_v12  ;;  %v2182_v15 = vsel %vm4677_vm2, %v3569_v55, %v2181_v51  ;;  %v2112_v39 = vld [vmem:[#allocation2 + $0x60] sm:$0xe]  ;;  %v1315_v48 = vrot.slane %v4556_v19, 5  ;;  %v702_v13 = vld [vmem:[#allocation2 + $0x60] sm:$0x1] }
  0x8d   : > { %v3478_v17 = vcombine.low %v925_v50, %v935_v45  ;;  %v944_v18 = vrot.slane %v943_v26, 4  ;;  %v2188_v0 = vrot.slane %v4950_v10, 5  ;;  %3870 = vmatmul.mubr.msk.bf16.gmra.mrb[8].mxu0 %vm986_vm13, %v3577_v16  ;;  %v3488_v45 = vcombine.low %v4602_v23, %v4564_v35  ;;  %v383_v51 = vld [vmem:[%s360_s30] sm:$0xf]  ;;  %v384_v11 = vld [vmem:[%s360_s30 + $0x4] sm:$0xf] }
  0x8e   : > { %v2185_v25 = vsel %vm4677_vm2, %v2183_v32, %v2184_v47  ;;  %v393_v12 = vstv %s4927_s13  ;;  %v3570_v55 = vrot.slane %v2112_v39, 9  ;;  %v3505_v50 = vrot.slane %v1277_v62, 9  ;;  %v1276_v32 = vld [vmem:[#allocation2] sm:$0xe]  ;;  %s321_s13 = sand.u32 1, %s4233_s19   ;;  %s3665_s30 = sshll.u32 %s4241_s21, 4 }
  0x8f   : > { %3783 = vmatprep.mubr.msk.bf16.mxu1 %vm986_vm13, %v3478_v17  ;;  %v949_v7 = vsel %vm4548_vm14, %v944_v18, %v4909_v53  ;;  %v3578_v6 = vcombine.low %v2182_v15, %v2185_v25  ;;  %v1314_v26 = vrot.slane %v1312_v37, 4  ;;  %v2190_v53 = vrot.slane %v2188_v0, 4  ;;  %s3450_s15 = sshll.u32 %s321_s13, 6  ;;  %s3310_s9 = sadd.s32 %s3666_s8, %s3665_s30 }
  0x90   : > { %v3479_v19 = vcombine.low %v949_v7, %v959_v27  ;;  %v703_v23 = vsel %vm4434_vm8, 0, %v702_v13  ;;  %vm394_vm4 = vcmp.eq.s32.totalorder %v393_v12, 1  ;;  %v1305_v17 = vrot.slane %v4564_v35, 5  ;;  %v4144_v13 = vld [vmem:[#allocation2 + $0x18] sm:$0xff]   ;;  %v671_v12 = vld [vmem:[#allocation2 + $0x6c] sm:$0xf] }
  0x91   : > { %3873 = vmatprep.mubr.msk.bf16.mxu0 %vm986_vm13, %v3578_v6  ;;  %v4992_v27 = vsel %vm4677_vm2, %v3505_v50, %v1312_v37  ;;  %v4996_v40 = vsel %vm4677_vm2, %v1314_v26, %v1315_v48  ;;  %704 = vst [vmem:[#allocation2 + $0x60] sm:$0x1] %v703_v23  ;;  %v395_v18 = vsel %vm394_vm4, 0, %v383_v51  ;;  %v2189_v16 = vsel %vm4677_vm2, %v3570_v55, %v2188_v0  ;;  %v3529_v6 = vld [vmem:[%s5562_s3 + $0xc] sm:$0xf]  ;;  %s5449_s16 = scalar_lea.vmem [#allocation3], %s3450_s15 }
  0x92   : > { %3784 = vmatmul.mubr.msk.bf16.gmra.mrb[12].mxu1 %vm986_vm13, %v3479_v19  ;;  %v4987_v47 = vld [vmem:[#allocation2 + $0x68] sm:$0x1]  ;;  %v396_v35 = vsel %vm394_vm4, 0, %v384_v11  ;;  %v651_v62 = vshrl.u32 %v395_v18, 16  ;;  %v654_v7 = vshll.u32 %v395_v18, 16  ;;  %v1308_v25 = vrot.slane %v4605_v30, 5 }
  0x93   : > { %3789 = vmatprep.mubr.msk.bf16.mxu1 %vm986_vm13, %v3488_v45  ;;  %5591 = vst [vmem:[#allocation9_spill] sm:$0xff] %v4987_v47  ;;  %v2191_v15 = vrot.slane %v4987_v47, 5  ;;  %v659_v37 = vshrl.u32 %v396_v35, 16  ;;  %v662_v45 = vshll.u32 %v396_v35, 16  ;;  %v3490_v0 = vcombine.low %v4617_v42, %v4627_v9  ;;  %v2558_v50 = vld [vmem:[#allocation2 + $0x18] sm:$0xf] }
  0x94   : > { %v653_v55 = vrot.slane %v651_v62, 7  ;;  %v1410_v30 = vsel %vm1011_vm0, %v4667_v44, 0  ;;  %v3504_v26 = vrot.slane %v1276_v32, 9  ;;  %v5015_v11 = vld [vmem:[#allocation2 + $0x1c] sm:$0xf]  ;;  %v3492_v44 = vcombine.low %v4708_v5, %v4719_v61  ;;  %s3667_s21 = sshll.u32 %s3310_s9, 6 }
  0x95   : > { %v2192_v48 = vsel %vm4677_vm2, %v2190_v53, %v2191_v15  ;;  %v5011_v51 = vrot.slane %v659_v37, 7  ;;  %v1307_v53 = vrot.slane %v1305_v17, 4  ;;  %v2583_v32 = vshrl.u32 %v2558_v50, 16  ;;  %s3313_s22 = sshll.u32 %s5449_s16, 4  ;;  %s5495_s17 = scalar_lea.hbm %s5564_s5, %s3667_s21  ;;  %s5497_s22 = int_to_ptr.vmem [resolvable:$true] %s3313_s22 }
  0x96   : > { %v3579_v19 = vcombine.low %v2189_v16, %v2192_v48  ;;  %v656_v23 = vor.u32 %v654_v7, %v653_v55  ;;  %v657_v18 = vrot.slane %v653_v55, 4  ;;  %v3491_v16 = vcombine.low %v4633_v1, %v4648_v52  ;;  %v1278_v7 = vld [vmem:[#allocation2 + $0x18] sm:$0xe]  ;;  %s5507_s12 = scalar_lea.sflag [#allocation4], %s321_s13  ;;  %s4163_s14 = scalar_lea.vmem %s5497_s22, 1024 }
  0x97   : > { %v664_v42 = vor.u32 %v662_v45, %v5011_v51  ;;  %v2586_v1 = vshll.u32 %v2558_v50, 16  ;;  %v2825_v5 = vsel %vm1011_vm0, %v4810_v46, 0  ;;  %v2592_v37 = vshll.u32 %v5015_v11, 16  ;;  %v4145_v45 = vld [vmem:[#allocation2 + $0x24] sm:$0xff]   ;;  %p4164_p6 = scmp.ne.s32.totalorder %s5497_s22, %s4163_s14  ;;  %s4167_s15 = sshll.u32 %s4259_s26, 4  ;;  %s4168_s15 = int_to_ptr.vmem [resolvable:$false] %s4167_s15 }
  0x98   : > { %3874 = vmatmul.mubr.msk.bf16.gmra.mrb[12].mxu0 %vm986_vm13, %v3579_v19  ;;  %v672_v59 = vsel %vm4423_vm7, %v656_v23, %v671_v12  ;;  %v2596_v14 = vshrl.u32 %v5015_v11, 16  ;;  %v5047_v48 = vsel %vm4677_vm2, %v3504_v26, %v1305_v17  ;;  %v5051_v46 = vsel %vm4677_vm2, %v1307_v53, %v1308_v25  ;;  %v5054_v12 = vld [vmem:[#allocation2 + $0x28] sm:$0xf]  ;;  %v5056_v19 = vld [vmem:[#allocation2 + $0x20] sm:$0x1]  ;;  %v4146_v23 = vld [vmem:[#allocation2 + $0x30] sm:$0xff]   ;;  %p4170_p10 = scmp.lt.s32.totalorder %s5497_s22, %s4168_s15 }
  0x99   : > { %3879 = vmatprep.mubr.msk.bf16.mxu0 %vm986_vm13, %v4144_v13  ;;  %v665_v33 = vsel %vm4414_vm6, %v657_v18, %v664_v42  ;;  %673 = vst [vmem:[#allocation2 + $0x6c] sm:$0xf] %v672_v59  ;;  %v1319_v13 = vrot.slane %v4627_v9, 5  ;;  %v2588_v55 = vrot.slane %v2586_v1, 5  ;;  %v3506_v17 = vrot.slane %v1278_v7, 9  ;;  %p4165_p7 = pnand %p4164_p6, %p4343_p3  ;;  %s4169_s30 = scalar_lea.vmem %s4168_s15, 2048 }
  0x9a   : > { %3790 = vmatmul.mubr.msk.bf16.vlgmr.msra.gmra.mrb[0].mxu1 %vm986_vm13, %v3489_v43  ;;  %v2561_v43 = vld [vmem:[#allocation2 + $0x24] sm:$0xf]  ;;  %674 = vst.msk [vmem:[#allocation2 + $0x70] sm:$0xf] %vm561_vm3, %v665_v33  ;;  %v5060_v26 = vrot.slane %v2592_v37, 5  ;;  %v2598_v42 = vrot.slane %v2596_v14, 4  ;;  %p4171_p11 = scmp.lt.s32.totalorder %s4169_s30, %s4163_s14 }
  0x9b   : > { %3806 = vmatpush3.bf16.msra.mxu1 %v1410_v30  ;;  %3793 = vmatprep.mubr.msk.bf16.mxu1 %vm986_vm13, %v3490_v0  ;;  %v2585_v0 = vrot.slane %v2583_v32, 4  ;;  %v2607_v50 = vshrl.u32 %v2561_v43, 16  ;;  %v2610_v30 = vshll.u32 %v2561_v43, 16  ;;  %v1281_v25 = vld [vmem:[#allocation2 + $0x3c] sm:$0xe]  ;;  %v5065_v53 = vsel %vm1011_vm0, %v3529_v6, 0  ;;  %p4166_p9 = pneg %p4165_p7 }
  0x9c   : > { %4064 = vmatprep.subr.msk.bf16.mxu1 %vm1011_vm0, %v3529_v6  ;;  %v1279_v33 = vld [vmem:[#allocation2 + $0x24] sm:$0xe]  ;;  %v2616_v32 = vshll.u32 %v5054_v12, 16  ;;  %v2620_v59 = vshrl.u32 %v5054_v12, 16  ;;  %v1321_v1 = vrot.slane %v1319_v13, 4  ;;  %v1322_v43 = vrot.slane %v4629_v56, 5  ;;  %p4172_p12 = por %p4171_p11, %p4170_p10 }
  0x9d   : > { %v1326_v7 = vrot.slane %v4648_v52, 5  ;;  %v2602_v37 = vshll.u32 %v5056_v19, 16  ;;  %v5076_v14 = vld [vmem:[%s5562_s3 + $0x20] sm:$0xf]  ;;  %v2589_v6 = vor.u32 %v2588_v55, %v2585_v0  ;;  %v2609_v62 = vrot.slane %v2607_v50, 4 }
  0x9e   : > { %v2612_v35 = vrot.slane %v2610_v30, 5  ;;  %v3509_v39 = vrot.slane %v1281_v25, 9  ;;  %v5083_v52 = vsel %vm4677_vm2, %v3506_v17, %v1319_v13  ;;  %v1329_v9 = vrot.slane %v4694_v38, 5  ;;  %v2564_v55 = vld [vmem:[#allocation2 + $0x30] sm:$0xf]  ;;  %v4147_v50 = vld [vmem:[#allocation2 + $0x3c] sm:$0xff]   ;;  %p4173_p13 = pnand %p4172_p12, %p4166_p9 }
  0x9f   : > { %v2599_v18 = vor.u32 %v2598_v42, %v5060_v26  ;;  %v2622_v0 = vrot.slane %v2620_v59, 4  ;;  %v5096_v13 = vsel %vm4677_vm2, %v1321_v1, %v1322_v43  ;;  %v1328_v38 = vrot.slane %v1326_v7, 4  ;;  %v4148_v42 = vld [vmem:[#allocation2 + $0x48] sm:$0xff]  }
  0xa0   : > { %3880 = vmatmul.mubr.msk.bf16.vlgmr.msra.gmra.mrb[0].mxu0 %vm986_vm13, %v4145_v45  ;;  %v705_v56 = vld [vmem:[#allocation2 + $0x6c] sm:$0x1]  ;;  %v3507_v45 = vrot.slane %v1279_v33, 9  ;;  %v2604_v30 = vrot.slane %v2602_v37, 5  ;;  %v1343_v17 = vrot.slane %v4866_v58, 5  ;;  %v2590_v25 = vrot.slane %v2589_v6, 4 }
  0xa1   : > { %3896 = vmatpush3.bf16.msra.mxu0 %v2825_v5  ;;  %3883 = vmatprep.mubr.msk.bf16.mxu0 %vm986_vm13, %v4146_v23  ;;  %v5089_v5 = vrot.slane %v2616_v32, 5  ;;  %v5098_v23 = vld [vmem:[#allocation2 + $0x2c] sm:$0x1]  ;;  %v2613_v33 = vor.u32 %v2612_v35, %v2609_v62  ;;  %v1333_v1 = vrot.slane %v4719_v61, 5  ;;  %v2631_v43 = vshrl.u32 %v2564_v55, 16 }
  0xa2   : > { %3794 = vmatmul.mubr.msk.bf16.gmra.mrb[4].mxu1 %vm986_vm13, %v3491_v16  ;;  %v706_v16 = vsel %vm4434_vm8, 0, %v705_v56  ;;  %4070 = vmatprep.subr.msk.bf16.mxu0 %vm1011_vm0, %v5076_v14  ;;  %v5105_v56 = vld [vmem:[#allocation2 + $0x34] sm:$0xf]  ;;  %v2634_v37 = vshll.u32 %v2564_v55, 16  ;;  %v5110_v15 = vsel %vm4677_vm2, %v3507_v45, %v1326_v7  ;;  %v2626_v35 = vshll.u32 %v5098_v23, 16 }
  0xa3   : > { %3797 = vmatprep.mubr.msk.bf16.mxu1 %vm986_vm13, %v3492_v44  ;;  %v1340_v44 = vrot.slane %v4816_v34, 5  ;;  %707 = vst [vmem:[#allocation2 + $0x6c] sm:$0x1] %v706_v16  ;;  %v2600_v16 = vrot.slane %v2599_v18, 4  ;;  %v2623_v58 = vor.u32 %v2622_v0, %v5089_v5  ;;  %v5121_v62 = vsel %vm4677_vm2, %v1328_v38, %v1329_v9  ;;  %v2567_v55 = vld [vmem:[#allocation2 + $0x3c] sm:$0xf] }
  0xa4   : > { %v2640_v18 = vshll.u32 %v5105_v56, 16  ;;  %v2644_v7 = vshrl.u32 %v5105_v56, 16  ;;  %v5592_v6 = vcombine.low %v4859_v28, %v4816_v34  ;;  %v2595_v45 = vsel %vm4548_vm14, %v2590_v25, %v5060_v26  ;;  %v5166_v26 = vld [vmem:[#allocation2 + $0x44] sm:$0x1] }
  0xa5   : > { %v5103_v32 = vsel %vm4677_vm2, %v3509_v39, %v1340_v44  ;;  %v1342_v59 = vrot.slane %v1340_v44, 4  ;;  %v2614_v9 = vrot.slane %v2613_v33, 4  ;;  %v3508_v0 = vrot.slane %v1280_v22, 9  ;;  %v4149_v33 = vld [vmem:[#allocation2 + $0x54] sm:$0xff]  }
  0xa6   : > { %v1336_v44 = vrot.slane %v4749_v36, 5  ;;  %v5593_v38 = vcombine.low %v4907_v49, %v4873_v54  ;;  %v2605_v34 = vsel %vm4548_vm14, %v2600_v16, %v2604_v30  ;;  %v1335_v28 = vrot.slane %v1333_v1, 4 }
  0xa7   : > { %v5116_v39 = vsel %vm4677_vm2, %v1342_v59, %v1343_v17  ;;  %v2633_v17 = vrot.slane %v2631_v43, 4  ;;  %v1283_v59 = vld [vmem:[#allocation2 + $0x54] sm:$0xe]  ;;  %v2624_v22 = vrot.slane %v2623_v58, 4  ;;  %v2628_v25 = vrot.slane %v2626_v35, 5  ;;  %v4150_v43 = vld [vmem:[#allocation2 + $0x60] sm:$0xff]  }
  0xa8   : > { %3884 = vmatmul.mubr.msk.bf16.gmra.mrb[4].mxu0 %vm986_vm13, %v4147_v50  ;;  %v5136_v50 = vld [vmem:[#allocation2 + $0x40] sm:$0xf]  ;;  %v2646_v30 = vrot.slane %v2644_v7, 4  ;;  %v2655_v16 = vshrl.u32 %v2567_v55, 16  ;;  %v2619_v61 = vsel %vm4548_vm14, %v2614_v9, %v5089_v5  ;;  %v5160_v58 = vsel %vm4677_vm2, %v3508_v0, %v1333_v1 }
  0xa9   : > { %3887 = vmatprep.mubr.msk.bf16.mxu0 %vm986_vm13, %v4148_v42  ;;  %v2636_v42 = vrot.slane %v2634_v37, 5  ;;  %v5153_v37 = vcombine.low %v2595_v45, %v2605_v34  ;;  %v2658_v35 = vshll.u32 %v2567_v55, 16  ;;  %v5164_v49 = vsel %vm4677_vm2, %v1335_v28, %v1336_v44  ;;  %v2570_v34 = vld [vmem:[#allocation2 + $0x48] sm:$0xf] }
  0xaa   : > { %3798 = vmatmul.mubr.msk.bf16.gmra.mrb[8].mxu1 %vm986_vm13, %v5592_v6  ;;  %v5149_v6 = vld [vmem:[#allocation2 + $0x38] sm:$0x1]  ;;  %v2664_v7 = vshll.u32 %v5136_v50, 16  ;;  %v3511_v45 = vrot.slane %v1283_v59, 9  ;;  %v2629_v36 = vsel %vm4548_vm14, %v2624_v22, %v2628_v25  ;;  %v5173_v5 = vsel %vm1011_vm0, %v5076_v14, 0  ;;  %v4151_v47 = vld [vmem:[#allocation2 + $0x6c] sm:$0xff]  }
  0xab   : > { %3801 = vmatprep.mubr.msk.bf16.mxu1 %vm986_vm13, %v5593_v38  ;;  %v5151_v38 = vrot.slane %v2640_v18, 5  ;;  %v2637_v18 = vor.u32 %v2636_v42, %v2633_v17  ;;  %v2650_v1 = vshll.u32 %v5149_v6, 16  ;;  %v2668_v9 = vshrl.u32 %v5136_v50, 16  ;;  %v5181_v17 = vld [vmem:[#allocation2 + $0x4c] sm:$0xf] }
  0xac   : > { %v2657_v44 = vrot.slane %v2655_v16, 4  ;;  %v1354_v55 = vrot.slane %v4884_v29, 5  ;;  %v1357_v28 = vrot.slane %v4939_v31, 5  ;;  %v5594_v42 = vcombine.low %v4932_v20, %v4884_v29  ;;  %v5197_v16 = vld [vmem:[#allocation2 + $0x48] sm:$0xe] }
  0xad   : > { %v2647_v0 = vor.u32 %v2646_v30, %v5151_v38  ;;  %v2660_v14 = vrot.slane %v2658_v35, 5  ;;  %v2674_v59 = vshll.u32 %v5166_v26, 16  ;;  %v2679_v22 = vshrl.u32 %v2570_v34, 16 }
  0xae   : > { %v2682_v25 = vshll.u32 %v2570_v34, 16  ;;  %v5193_v31 = vrot.slane %v2637_v18, 4  ;;  %v5195_v30 = vrot.slane %v2664_v7, 5  ;;  %v5201_v29 = vsel %vm4677_vm2, %v3511_v45, %v1354_v55  ;;  %v5210_v7 = vld [vmem:[#allocation2 + $0x50] sm:$0x1] }
  0xaf   : > { %v1356_v20 = vrot.slane %v1354_v55, 4  ;;  %v2681_v35 = vrot.slane %v2679_v22, 4  ;;  %v2688_v34 = vshll.u32 %v5181_v17, 16  ;;  %v2573_v45 = vld [vmem:[#allocation2 + $0x54] sm:$0xf]  ;;  %v2648_v8 = vrot.slane %v2647_v0, 4 }
  0xb0   : > { %3888 = vmatmul.mubr.msk.bf16.gmra.mrb[8].mxu0 %vm986_vm13, %v4149_v33  ;;  %v5595_v33 = vcombine.low %v5047_v48, %v5051_v46  ;;  %v5204_v48 = vcombine.low %v2619_v61, %v2629_v36  ;;  %v2652_v46 = vrot.slane %v2650_v1, 5  ;;  %v5218_v61 = vld [vmem:[#allocation2 + $0x58] sm:$0xf]  ;;  %v2661_v36 = vor.u32 %v2660_v14, %v2657_v44 }
  0xb1   : > { %3891 = vmatprep.mubr.msk.bf16.mxu0 %vm986_vm13, %v4150_v43  ;;  %v2670_v43 = vrot.slane %v2668_v9, 4  ;;  %v5208_v18 = vsel %vm4677_vm2, %v1356_v20, %v1357_v28  ;;  %v3510_v9 = vrot.slane %v5197_v16, 9  ;;  %v5216_v22 = vrot.slane %v2688_v34, 5  ;;  %5596 = vst [vmem:[#allocation10_spill] sm:$0xff] %v5218_v61  ;;  %v2576_v20 = vld [vmem:[#allocation2 + $0x60] sm:$0xf] }
  0xb2   : > { %3802 = vmatmul.mubr.msk.bf16.gmra.mrb[12].mxu1 %vm986_vm13, %v5594_v42  ;;  %v2684_v42 = vrot.slane %v2682_v25, 5  ;;  %v5220_v1 = vrot.slane %v2674_v59, 5  ;;  %v1347_v28 = vrot.slane %v4873_v54, 5  ;;  %v2643_v0 = vsel %vm4548_vm14, %v5193_v31, %v5151_v38  ;;  %v5228_v34 = vld [vmem:[#allocation2 + $0x64] sm:$0xf] }
  0xb3   : > { %3807 = vmatprep.mubr.msk.bf16.mxu1 %vm986_vm13, %v5595_v33  ;;  %v2692_v33 = vshrl.u32 %v5181_v17, 16  ;;  %v2671_v16 = vor.u32 %v2670_v43, %v5195_v30  ;;  %v2703_v55 = vshrl.u32 %v2573_v45, 16  ;;  %5597 = vst [vmem:[#allocation11_spill] sm:$0xff] %v5228_v34  ;;  %v1350_v44 = vrot.slane %v4916_v60, 5  ;;  %v675_v60 = vld [vmem:[#allocation2 + $0x74] sm:$0x1] }
  0xb4   : > { %v2685_v10 = vor.u32 %v2684_v42, %v2681_v35  ;;  %v2706_v14 = vshll.u32 %v2573_v45, 16  ;;  %v2712_v54 = vshll.u32 %v5218_v61, 16  ;;  %v2716_v59 = vshrl.u32 %v5218_v61, 16  ;;  %v2579_v61 = vld [vmem:[#allocation2 + $0x6c] sm:$0xf] }
  0xb5   : > { %v2694_v25 = vrot.slane %v2692_v33, 4  ;;  %v5598_v33 = vcombine.low %v4992_v27, %v4996_v40  ;;  %v2698_v31 = vshll.u32 %v5210_v7, 16  ;;  %v2730_v43 = vshll.u32 %v2576_v20, 16 }
  0xb6   : > { %v5599_v35 = vcombine.low %v5083_v52, %v5096_v13  ;;  %v2653_v27 = vsel %vm4548_vm14, %v2648_v8, %v2652_v46  ;;  %v2662_v40 = vrot.slane %v2661_v36, 4  ;;  %v1349_v42 = vrot.slane %v1347_v28, 4 }
  0xb7   : > { %v2695_v38 = vor.u32 %v2694_v25, %v5216_v22  ;;  %v2672_v45 = vrot.slane %v2671_v16, 4  ;;  %v2686_v25 = vrot.slane %v2685_v10, 4  ;;  %v2708_v52 = vrot.slane %v2706_v14, 5 }
  0xb8   : > { %3892 = vmatmul.mubr.msk.bf16.gmra.mrb[12].mxu0 %vm986_vm13, %v4151_v47  ;;  %v2727_v47 = vshrl.u32 %v2576_v20, 16  ;;  %v4160_v20 = vld [vmem:[%s5562_s3 + $0x10] sm:$0xf]  ;;  %v5255_v13 = vrot.slane %v2712_v54, 5  ;;  %v5600_v8 = vrot.slane %v5011_v51, 4  ;;  %v2700_v10 = vrot.slane %v2698_v31, 5 }
  0xb9   : > { %3897 = vmatprep.mubr.msk.bf16.mxu0 %vm986_vm13, %v5153_v37  ;;  %v2736_v37 = vshll.u32 %v5228_v34, 16  ;;  %v2696_v36 = vrot.slane %v2695_v38, 4  ;;  %v2732_v21 = vrot.slane %v2730_v43, 5  ;;  %v2667_v51 = vsel %vm4548_vm14, %v2662_v40, %v5195_v30  ;;  %v5275_v31 = vld [vmem:[#allocation2 + $0x68] sm:$0x1] }
  0xba   : > { %3808 = vmatmul.mubr.msk.bf16.vlgmr.msra.gmra.mrb[0].mxu1 %vm986_vm13, %v5598_v33  ;;  %v2705_v33 = vrot.slane %v2703_v55, 4  ;;  %v676_v46 = vsel %vm4434_vm8, %v5600_v8, %v675_v60  ;;  %v5261_v55 = vld [vmem:[#allocation2 + $0x5c] sm:$0x1]  ;;  %v2729_v16 = vrot.slane %v2727_v47, 4  ;;  %v2677_v24 = vsel %vm4548_vm14, %v2672_v45, %v5220_v1 }
  0xbb   : > { %3824 = vmatpush3.bf16.msra.mxu1 %v5065_v53  ;;  %3811 = vmatprep.mubr.msk.bf16.mxu1 %vm986_vm13, %v5599_v35  ;;  %v2740_v53 = vshrl.u32 %v5228_v34, 16  ;;  %v2718_v35 = vrot.slane %v2716_v59, 4  ;;  %677 = vst [vmem:[#allocation2 + $0x74] sm:$0x1] %v676_v46  ;;  %v3608_v34 = vcombine.low %v2643_v0, %v2653_v27  ;;  %v2738_v14 = vrot.slane %v2736_v37, 5 }
  0xbc   : > { %4066 = vmatprep.subr.msk.bf16.mxu1 %vm1011_vm0, %v4160_v20  ;;  %v3517_v20 = vcombine.low %v5160_v58, %v5164_v49  ;;  %v1348_v59 = vsel %vm4677_vm2, %v3510_v9, %v1347_v28  ;;  %v1351_v38 = vsel %vm4677_vm2, %v1349_v42, %v1350_v44  ;;  %v5277_v49 = vld [vmem:[#allocation2 + $0x70] sm:$0xf]  ;;  %v2691_v58 = vsel %vm4548_vm14, %v2686_v25, %v5216_v22 }
  0xbd   : > { %v2742_v54 = vrot.slane %v2740_v53, 4  ;;  %v2709_v30 = vor.u32 %v2708_v52, %v2705_v33  ;;  %v2719_v1 = vor.u32 %v2718_v35, %v5255_v13  ;;  %v2722_v0 = vshll.u32 %v5261_v55, 16 }
  0xbe   : > { %v5601_v9 = vcombine.low %v5110_v15, %v5121_v62  ;;  %v2701_v28 = vsel %vm4548_vm14, %v2696_v36, %v2700_v10  ;;  %v2751_v44 = vshrl.u32 %v2579_v61, 16  ;;  %v2754_v47 = vshll.u32 %v2579_v61, 16 }
  0xbf   : > { %v2743_v22 = vor.u32 %v2742_v54, %v2738_v14  ;;  %v2746_v43 = vshll.u32 %v5275_v31, 16  ;;  %v2760_v60 = vshll.u32 %v5277_v49, 16  ;;  %v2764_v15 = vshrl.u32 %v5277_v49, 16 }
  0xc0   : > { %3898 = vmatmul.mubr.msk.bf16.vlgmr.msra.gmra.mrb[0].mxu0 %vm986_vm13, %v5204_v48  ;;  %v2733_v48 = vor.u32 %v2732_v21, %v2729_v16  ;;  %v5602_v62 = vshll.u32 %v4897_v41, 16  ;;  %v5603_v27 = vshrl.u32 %v4897_v41, 16  ;;  %v3609_v40 = vcombine.low %v2667_v51, %v2677_v24  ;;  %v2940_v51 = vld [vmem:[#allocation2 + $0x18] sm:$0xe] }
  0xc1   : > { %3914 = vmatpush3.bf16.msra.mxu0 %v5173_v5  ;;  %3901 = vmatprep.mubr.msk.bf16.mxu0 %vm986_vm13, %v3608_v34  ;;  %v3519_v61 = vcombine.low %v1348_v59, %v1351_v38  ;;  %v3610_v42 = vcombine.low %v2691_v58, %v2701_v28  ;;  %v2710_v37 = vrot.slane %v2709_v30, 4  ;;  %v2720_v45 = vrot.slane %v2719_v1, 4  ;;  %v1738_v58 = vld [vmem:[#allocation2 + $0x48] sm:$0xf] }
  0xc2   : > { %3812 = vmatmul.mubr.msk.bf16.gmra.mrb[4].mxu1 %vm986_vm13, %v5601_v9  ;;  %v5300_v5 = vrot.slane %v5602_v62, 5  ;;  %v1883_v21 = vrot.slane %v5603_v27, 4  ;;  %v2724_v34 = vrot.slane %v2722_v0, 5  ;;  %v736_v25 = vld [vmem:[#allocation2 + $0x74] sm:$0x1]  ;;  %v2734_v33 = vrot.slane %v2733_v48, 4 }
  0xc3   : > { %3815 = vmatprep.mubr.msk.bf16.mxu1 %vm986_vm13, %v3517_v20  ;;  %v737_v53 = vsel %vm4474_vm10, 0, %v736_v25  ;;  %v2753_v52 = vrot.slane %v2751_v44, 4  ;;  %v2756_v35 = vrot.slane %v2754_v47, 5  ;;  %v2744_v8 = vrot.slane %v2743_v22, 4  ;;  %v4152_v44 = vld [vmem:[#allocation2 + $0xc] sm:$0xff]  }
  0xc4   : > { %v2748_v46 = vrot.slane %v2746_v43, 5  ;;  %738 = vst [vmem:[#allocation2 + $0x74] sm:$0x1] %v737_v53  ;;  %v2762_v36 = vrot.slane %v2760_v60, 5  ;;  %v2766_v10 = vrot.slane %v2764_v15, 4  ;;  %v1887_v41 = vshll.u32 %v4935_v57, 16 }
  0xc5   : > { %v5604_v16 = vcombine.low %v5103_v32, %v5116_v39  ;;  %v2715_v63 = vsel %vm4548_vm14, %v2710_v37, %v5255_v13  ;;  %v2725_v20 = vsel %vm4548_vm14, %v2720_v45, %v2724_v34  ;;  %v2757_v54 = vor.u32 %v2756_v35, %v2753_v52  ;;  %v4153_v53 = vld [vmem:[#allocation2 + $0x18] sm:$0xff]  }
  0xc6   : > { %v2974_v57 = vrot.slane %v5015_v11, 5  ;;  %v1884_v24 = vor.u32 %v1883_v21, %v5300_v5  ;;  %v2739_v32 = vsel %vm4548_vm14, %v2734_v33, %v2738_v14  ;;  %v2749_v39 = vsel %vm4548_vm14, %v2744_v8, %v2748_v46  ;;  %v2941_v21 = vld [vmem:[#allocation2 + $0x24] sm:$0xe]  ;;  %v1735_v35 = vld [vmem:[#allocation2 + $0x3c] sm:$0xf] }
  0xc7   : > { %v2767_v59 = vor.u32 %v2766_v10, %v2762_v36  ;;  %v3611_v38 = vcombine.low %v2715_v63, %v2725_v20  ;;  %v3622_v13 = vrot.slane %v2940_v51, 9  ;;  %v3612_v30 = vcombine.low %v2739_v32, %v2749_v39  ;;  %v4154_v46 = vld [vmem:[#allocation2 + $0x24] sm:$0xff]   ;;  %v2943_v20 = vld [vmem:[#allocation2 + $0x3c] sm:$0xe] }
  0xc8   : > { %3902 = vmatmul.mubr.msk.bf16.gmra.mrb[4].mxu0 %vm986_vm13, %v3609_v40  ;;  %v2758_v0 = vrot.slane %v2757_v54, 4  ;;  %v2976_v9 = vrot.slane %v2974_v57, 4  ;;  %v2977_v11 = vrot.slane %v5056_v19, 5  ;;  %v1885_v28 = vrot.slane %v1884_v24, 4 }
  0xc9   : > { %3905 = vmatprep.mubr.msk.bf16.mxu0 %vm986_vm13, %v3610_v42  ;;  %v1889_v48 = vrot.slane %v1887_v41, 5  ;;  %v2768_v47 = vrot.slane %v2767_v59, 4  ;;  %v2981_v43 = vrot.slane %v5054_v12, 5  ;;  %v1868_v60 = vshrl.u32 %v1738_v58, 16  ;;  %v2942_v42 = vld [vmem:[#allocation2 + $0x30] sm:$0xe] }
  0xca   : > { %3816 = vmatmul.mubr.msk.bf16.gmra.mrb[8].mxu1 %vm986_vm13, %v5604_v16  ;;  %v5605_v15 = vcombine.low %v5201_v29, %v5208_v18  ;;  %v2763_v19 = vsel %vm4548_vm14, %v2758_v0, %v2762_v36  ;;  %v2975_v62 = vsel %vm4677_vm2, %v3622_v13, %v2974_v57  ;;  %v2978_v27 = vsel %vm4677_vm2, %v2976_v9, %v2977_v11  ;;  %v2944_v57 = vld [vmem:[#allocation2 + $0x48] sm:$0xe] }
  0xcb   : > { %3819 = vmatprep.mubr.msk.bf16.mxu1 %vm986_vm13, %v3519_v61  ;;  %v5325_v1 = vld [vmem:[#allocation2 + $0x74] sm:$0x1]  ;;  %v1871_v40 = vshll.u32 %v1738_v58, 16  ;;  %v2988_v29 = vrot.slane %v5105_v56, 5  ;;  %v1870_v18 = vrot.slane %v1868_v60, 4  ;;  %v1890_v61 = vsel %vm4548_vm14, %v1885_v28, %v1889_v48 }
  0xcc   : > { %v2770_v14 = vshll.u32 %v5325_v1, 16  ;;  %v3623_v34 = vrot.slane %v2941_v21, 9  ;;  %v2983_v25 = vrot.slane %v2981_v43, 4  ;;  %v2984_v33 = vrot.slane %v5098_v23, 5  ;;  %v4155_v28 = vld [vmem:[#allocation2 + $0x30] sm:$0xff]  }
  0xcd   : > { %v1873_v37 = vrot.slane %v1871_v40, 5  ;;  %v3631_v52 = vcombine.low %v2975_v62, %v2978_v27  ;;  %v3624_v36 = vrot.slane %v2942_v42, 9  ;;  %v2990_v10 = vrot.slane %v2988_v29, 4  ;;  %v4162_v62 = vld [vmem:[#allocation2 + $0x44] sm:$0x1] }
  0xce   : > { %v2772_v22 = vrot.slane %v2770_v14, 5  ;;  %v2991_v56 = vrot.slane %v5149_v6, 5  ;;  %v2995_v41 = vrot.slane %v5136_v50, 5  ;;  %v2982_v63 = vsel %vm4677_vm2, %v3623_v34, %v2981_v43  ;;  %v4161_v50 = vld [vmem:[#allocation2 + $0x40] sm:$0xf] }
  0xcf   : > { %v1874_v8 = vor.u32 %v1873_v37, %v1870_v18  ;;  %v2985_v23 = vsel %vm4677_vm2, %v2983_v25, %v2984_v33  ;;  %v1844_v54 = vshrl.u32 %v1735_v35, 16  ;;  %v1847_v51 = vshll.u32 %v1735_v35, 16  ;;  %v1741_v21 = vld [vmem:[#allocation2 + $0x54] sm:$0xf]  ;;  %v5607_v18 = vld [vmem:[#allocation11_spill] sm:$0xff] }
  0xd0   : > { %3906 = vmatmul.mubr.msk.bf16.gmra.mrb[8].mxu0 %vm986_vm13, %v3611_v38  ;;  %v2773_v12 = vsel %vm4548_vm14, %v2768_v47, %v2772_v22  ;;  %v3002_v6 = vrot.slane %v5181_v17, 5  ;;  %v1853_v24 = vshll.u32 %v4161_v50, 16  ;;  %v1857_v32 = vshrl.u32 %v4161_v50, 16  ;;  %v4156_v22 = vld [vmem:[#allocation2 + $0x3c] sm:$0xff]  }
  0xd1   : > { %3909 = vmatprep.mubr.msk.bf16.mxu0 %vm986_vm13, %v3612_v30  ;;  %v3613_v45 = vcombine.low %v2763_v19, %v2773_v12  ;;  %v1875_v16 = vrot.slane %v1874_v8, 4  ;;  %v2989_v59 = vsel %vm4677_vm2, %v3624_v36, %v2988_v29  ;;  %v2992_v38 = vsel %vm4677_vm2, %v2990_v10, %v2991_v56  ;;  %v2946_v34 = vld [vmem:[#allocation2 + $0x60] sm:$0xe]  ;;  %v4157_v56 = vld [vmem:[#allocation2 + $0x48] sm:$0xff]  }
  0xd2   : > { %3820 = vmatmul.mubr.msk.bf16.gmra.mrb[12].mxu1 %vm986_vm13, %v5605_v15  ;;  %v3632_v17 = vcombine.low %v2982_v63, %v2985_v23  ;;  %v3625_v58 = vrot.slane %v2943_v20, 9  ;;  %v2997_v30 = vrot.slane %v2995_v41, 4  ;;  %v2998_v0 = vrot.slane %v5166_v26, 5  ;;  %v2945_v15 = vld [vmem:[#allocation2 + $0x54] sm:$0xe]  ;;  %v5606_v26 = vld [vmem:[#allocation10_spill] sm:$0xff] }
  0xd3   : > { %3825 = vmatprep.mubr.msk.bf16.mxu1 %vm986_vm13, %v4152_v44  ;;  %v1880_v39 = vsel %vm4548_vm14, %v1875_v16, %v5300_v5  ;;  %v3626_v9 = vrot.slane %v2944_v57, 9  ;;  %v3005_v5 = vrot.slane %v5210_v7, 5  ;;  %v1846_v11 = vrot.slane %v1844_v54, 4  ;;  %v4158_v20 = vld [vmem:[#allocation2 + $0x54] sm:$0xff]  }
  0xd4   : > { %v5368_v13 = vcombine.low %v1880_v39, %v1890_v61  ;;  %v3633_v48 = vcombine.low %v2989_v59, %v2992_v38  ;;  %v3004_v44 = vrot.slane %v3002_v6, 4  ;;  %v5372_v47 = vrot.slane %v1853_v24, 5  ;;  %v2947_v38 = vld [vmem:[#allocation2 + $0x6c] sm:$0xe] }
  0xd5   : > { %v1859_v14 = vrot.slane %v1857_v32, 4  ;;  %v2996_v43 = vsel %vm4677_vm2, %v3625_v58, %v2995_v41  ;;  %v2999_v60 = vsel %vm4677_vm2, %v2997_v30, %v2998_v0  ;;  %v3009_v7 = vrot.slane %v5606_v26, 5  ;;  %v5609_v0 = vld [vmem:[#allocation8_spill] sm:$0xff] }
  0xd6   : > { %v1863_v27 = vshll.u32 %v4162_v62, 16  ;;  %v3003_v40 = vsel %vm4677_vm2, %v3626_v9, %v3002_v6  ;;  %v3006_v12 = vsel %vm4677_vm2, %v3004_v44, %v3005_v5  ;;  %v3016_v61 = vrot.slane %v5607_v18, 5  ;;  %v1744_v6 = vld [vmem:[#allocation2 + $0x60] sm:$0xf]  ;;  %v5611_v18 = vld [vmem:[#allocation9_spill] sm:$0xff] }
  0xd7   : > { %v1860_v29 = vor.u32 %v1859_v14, %v5372_v47  ;;  %v3634_v42 = vcombine.low %v2996_v43, %v2999_v60  ;;  %v3627_v37 = vrot.slane %v2945_v15, 9  ;;  %v1892_v25 = vshrl.u32 %v1741_v21, 16  ;;  %v4159_v14 = vld [vmem:[#allocation2 + $0x60] sm:$0xff]  }
  0xd8   : > { %3910 = vmatmul.mubr.msk.bf16.gmra.mrb[12].mxu0 %vm986_vm13, %v3613_v45  ;;  %v3012_v45 = vrot.slane %v5261_v55, 5  ;;  %v1895_v33 = vshll.u32 %v1741_v21, 16  ;;  %v3635_v8 = vcombine.low %v3003_v40, %v3006_v12  ;;  %v1865_v10 = vrot.slane %v1863_v27, 5 }
  0xd9   : > { %3915 = vmatprep.mubr.msk.bf16.mxu0 %vm986_vm13, %v3631_v52  ;;  %v1861_v41 = vrot.slane %v1860_v29, 4  ;;  %v3628_v16 = vrot.slane %v2946_v34, 9  ;;  %v3018_v63 = vrot.slane %v3016_v61, 4  ;;  %v3019_v23 = vrot.slane %v5275_v31, 5 }
  0xda   : > { %3826 = vmatmul.mubr.msk.bf16.vlgmr.msra.gmra.mrb[0].mxu1 %vm986_vm13, %v4153_v53  ;;  %v5608_v53 = vld [vmem:[#allocation6_spill] sm:$0xff]  ;;  %v1894_v54 = vrot.slane %v1892_v25, 4  ;;  %v1897_v55 = vrot.slane %v1895_v33, 5  ;;  %v3010_v50 = vsel %vm4677_vm2, %v3627_v37, %v3009_v7  ;;  %v1916_v58 = vshrl.u32 %v1744_v6, 16 }
  0xdb   : > { %3932 = vmatpush3.bf16.msra.mxu1 %v4372_v2  ;;  %3829 = vmatprep.mubr.msk.bf16.mxu1 %vm986_vm13, %v4154_v46  ;;  %v1849_v2 = vrot.slane %v1847_v51, 5  ;;  %v1901_v52 = vshll.u32 %v5608_v53, 16  ;;  %v1905_v35 = vshrl.u32 %v5608_v53, 16  ;;  %v3011_v46 = vrot.slane %v3009_v7, 4 }
  0xdc   : > { %v1866_v31 = vsel %vm4548_vm14, %v1861_v41, %v1865_v10  ;;  %v3017_v39 = vsel %vm4677_vm2, %v3628_v16, %v3016_v61  ;;  %v3020_v59 = vsel %vm4677_vm2, %v3018_v63, %v3019_v23  ;;  %v1919_v30 = vshll.u32 %v1744_v6, 16 }
  0xdd   : > { %v1850_v19 = vor.u32 %v1849_v2, %v1846_v11  ;;  %v1903_v51 = vrot.slane %v1901_v52, 5  ;;  %v1907_v57 = vrot.slane %v1905_v35, 4  ;;  %v3013_v24 = vsel %vm4677_vm2, %v3011_v46, %v3012_v45 }
  0xde   : > { %v1925_v9 = vshll.u32 %v5609_v0, 16  ;;  %v1929_v5 = vshrl.u32 %v5609_v0, 16  ;;  %v1898_v11 = vor.u32 %v1897_v55, %v1894_v54  ;;  %v3636_v44 = vcombine.low %v3010_v50, %v3013_v24 }
  0xdf   : > { %v1851_v36 = vrot.slane %v1850_v19, 4  ;;  %v1908_v2 = vor.u32 %v1907_v57, %v1903_v51  ;;  %v3637_v43 = vcombine.low %v3017_v39, %v3020_v59  ;;  %v1918_v15 = vrot.slane %v1916_v58, 4 }
  0xe0   : > { %3916 = vmatmul.mubr.msk.bf16.vlgmr.msra.gmra.mrb[0].mxu0 %vm986_vm13, %v3632_v17  ;;  %v3023_v17 = vrot.slane %v5277_v49, 5  ;;  %v3026_v49 = vrot.slane %v5325_v1, 5  ;;  %v1921_v26 = vrot.slane %v1919_v30, 5  ;;  %v1927_v7 = vrot.slane %v1925_v9, 5 }
  0xe1   : > { %3919 = vmatprep.mubr.msk.bf16.mxu0 %vm986_vm13, %v3633_v48  ;;  %v1856_v32 = vsel %vm4548_vm14, %v1851_v36, %v5372_v47  ;;  %v3629_v47 = vrot.slane %v2947_v38, 9  ;;  %v1931_v19 = vrot.slane %v1929_v5, 4  ;;  %v1899_v62 = vrot.slane %v1898_v11, 4 }
  0xe2   : > { %3830 = vmatmul.mubr.msk.bf16.gmra.mrb[4].mxu1 %vm986_vm13, %v4155_v28  ;;  %v5610_v28 = vld [vmem:[#allocation7_spill] sm:$0xff]  ;;  %v3025_v60 = vrot.slane %v3023_v17, 4  ;;  %v1909_v27 = vrot.slane %v1908_v2, 4  ;;  %v1922_v1 = vor.u32 %v1921_v26, %v1918_v15  ;;  %v1935_v61 = vshll.u32 %v5611_v18, 16 }
  0xe3   : > { %3833 = vmatprep.mubr.msk.bf16.mxu1 %vm986_vm13, %v4156_v22  ;;  %v1911_v48 = vshll.u32 %v5610_v28, 16  ;;  %v3551_v22 = vcombine.low %v1856_v32, %v1866_v31  ;;  %v3024_v40 = vsel %vm4677_vm2, %v3629_v47, %v3023_v17  ;;  %v1932_v29 = vor.u32 %v1931_v19, %v1927_v7 }
  0xe4   : > { %v3027_v12 = vsel %vm4677_vm2, %v3025_v60, %v3026_v49  ;;  %v1923_v25 = vrot.slane %v1922_v1, 4  ;;  %v1937_v53 = vrot.slane %v1935_v61, 5  ;;  %vm3280_vm0 = vcmask 519168  }
  0xe5   : > { %v1913_v21 = vrot.slane %v1911_v48, 5  ;;  %v3638_v45 = vcombine.low %v3024_v40, %v3027_v12  ;;  %v1933_v33 = vrot.slane %v1932_v29, 4 }
  0xe6   : > { %v1928_v3 = vsel %vm4548_vm14, %v1923_v25, %v1927_v7 }
  0xe7   : > { %v1914_v37 = vsel %vm4548_vm14, %v1909_v27, %v1913_v21  ;;  %v1938_v52 = vsel %vm4548_vm14, %v1933_v33, %v1937_v53 }
  0xe8   : > { %3920 = vmatmul.mubr.msk.bf16.gmra.mrb[4].mxu0 %vm986_vm13, %v3634_v42  ;;  %v1904_v42 = vsel %vm4548_vm14, %v1899_v62, %v1903_v51  ;;  %v3554_v35 = vcombine.low %v1928_v3, %v1938_v52 }
  0xe9   : > { %3923 = vmatprep.mubr.msk.bf16.mxu0 %vm986_vm13, %v3635_v8  ;;  %v3553_v34 = vcombine.low %v1904_v42, %v1914_v37 }
  0xea   : > { %3834 = vmatmul.mubr.msk.bf16.gmra.mrb[8].mxu1 %vm986_vm13, %v4157_v56 }
  0xeb   : > { %3837 = vmatprep.mubr.msk.bf16.mxu1 %vm986_vm13, %v4158_v20 }
  0xf0   : > { %3924 = vmatmul.mubr.msk.bf16.gmra.mrb[8].mxu0 %vm986_vm13, %v3636_v44 }
  0xf1   : > { %3927 = vmatprep.mubr.msk.bf16.mxu0 %vm986_vm13, %v3637_v43 }
  0xf2   : > { %3838 = vmatmul.mubr.msk.bf16.gmra.mrb[12].mxu1 %vm986_vm13, %v4159_v14 }
  0xf3   : > { %3851 = vmatprep.mubr.msk.bf16.mxu1 %vm986_vm13, %v3551_v22 }
  0xf8   : > { %3928 = vmatmul.mubr.msk.bf16.gmra.mrb[12].mxu0 %vm986_vm13, %v3638_v45 }
  0xfa   : > { %3852 = vmatmul.mubr.msk.bf16.vlgmr.msra.gmra.mrb[8].mxu1 %vm986_vm13, %v5368_v13  ;;  %v5441_v13 = vld [vmem:[%s5563_s4] ss:$0 sm:$0xff] }
  0xfb   : > { %3855 = vmatprep.mubr.msk.bf16.mxu1 %vm986_vm13, %v3553_v34 }
 0x102   : > { %3856 = vmatmul.mubr.msk.bf16.gmra.mrb[12].mxu1 %vm986_vm13, %v3554_v35 }
 0x1ad   : > { %v3827_v8 = vpop.f32.mrb[0].mxu1 }
 0x1ae   : > { %v1644_v46 = vpop.f32.mrb[1].mxu1 }
 0x1af   : > { %v3828_v36 = vpop.f32.mrb[2].mxu1 }
 0x1b0   : > { %v1647_v10 = vpop.f32.mrb[3].mxu1 }
 0x1b3   : > { %v3917_v56 = vpop.f32.mrb[0].mxu0 }
 0x1b4   : > { %v3933_v16 = vadd.f32 %v3917_v56, %v3827_v8  ;;  %v3115_v4 = vpop.f32.mrb[1].mxu0 }
 0x1b5   : > { %v3831_v41 = vpop.f32.mrb[4].mxu1  ;;  %v3934_v23 = vadd.f32 %v3115_v4, %v1644_v46  ;;  %v3918_v20 = vpop.f32.mrb[2].mxu0 }
 0x1b6   : > { %v1660_v63 = vpop.f32.mrb[5].mxu1  ;;  %v3202_v55 = vadd.f32 %v3933_v16, %v5441_v13  ;;  %v3935_v51 = vadd.f32 %v3918_v20, %v3828_v36  ;;  %v3118_v57 = vpop.f32.mrb[3].mxu0 }
 0x1b7   : > { %v3832_v54 = vpop.f32.mrb[6].mxu1  ;;  %v3200_v50 = vadd.f32 %v3934_v23, %v5441_v13  ;;  %v3936_v24 = vadd.f32 %v3118_v57, %v1647_v10 }
 0x1b8   : > { %v1663_v6 = vpop.f32.mrb[7].mxu1  ;;  %v3674_v32 = vpack.c.bf16 %v3202_v55, %v3202_v55  ;;  %v3203_v31 = vadd.f32 %v3935_v51, %v5441_v13 }
 0x1b9   : > { %v3672_v39 = vpack.c.bf16 %v3200_v50, %v3200_v50  ;;  %v3201_v59 = vadd.f32 %v3936_v24, %v5441_v13 }
 0x1ba   : > { %3283 = vst.msk [vmem:[%s5449_s16 + $0x8] sm:$0xf] %vm3280_vm0, %v3674_v32  ;;  %v3675_v38 = vpack.c.bf16 %v3203_v31, %v3203_v31 }
 0x1bb   : > { %3281 = vst.msk [vmem:[%s5449_s16] sm:$0xf] %vm3280_vm0, %v3672_v39  ;;  %v3673_v17 = vpack.c.bf16 %v3201_v59, %v3201_v59  ;;  %v3921_v58 = vpop.f32.mrb[4].mxu0 }
 0x1bc   : > { %3284 = vst.msk [vmem:[%s5449_s16 + $0xc] sm:$0xf] %vm3280_vm0, %v3675_v38  ;;  %v3937_v30 = vadd.f32 %v3921_v58, %v3831_v41  ;;  %v3131_v0 = vpop.f32.mrb[5].mxu0 }
 0x1bd   : > { %3282 = vst.msk [vmem:[%s5449_s16 + $0x4] sm:$0xf] %vm3280_vm0, %v3673_v17  ;;  %v3938_v9 = vadd.f32 %v3131_v0, %v1660_v63  ;;  %v3922_v5 = vpop.f32.mrb[6].mxu0 }
 0x1be   : > { %v3206_v11 = vadd.f32 %v3937_v30, %v5441_v13  ;;  %v3939_v2 = vadd.f32 %v3922_v5, %v3832_v54  ;;  %v3134_v28 = vpop.f32.mrb[7].mxu0 }
 0x1bf   : > { %v3204_v48 = vadd.f32 %v3938_v9, %v5441_v13  ;;  %v3940_v44 = vadd.f32 %v3134_v28, %v1663_v6 }
 0x1c0   : > { %v3678_v47 = vpack.c.bf16 %v3206_v11, %v3206_v11  ;;  %v3207_v14 = vadd.f32 %v3939_v2, %v5441_v13 }
 0x1c1   : > { %v3676_v22 = vpack.c.bf16 %v3204_v48, %v3204_v48  ;;  %v3205_v43 = vadd.f32 %v3940_v44, %v5441_v13 }
 0x1c2   : > { %3287 = vst.msk [vmem:[%s5449_s16 + $0x18] sm:$0xf] %vm3280_vm0, %v3678_v47  ;;  %v3679_v60 = vpack.c.bf16 %v3207_v14, %v3207_v14 }
 0x1c3   : > { %3285 = vst.msk [vmem:[%s5449_s16 + $0x10] sm:$0xf] %vm3280_vm0, %v3676_v22  ;;  %v3677_v49 = vpack.c.bf16 %v3205_v43, %v3205_v43  ;;  %v3925_v15 = vpop.f32.mrb[8].mxu0 }
 0x1c4   : > { %3288 = vst.msk [vmem:[%s5449_s16 + $0x1c] sm:$0xf] %vm3280_vm0, %v3679_v60  ;;  %v3147_v26 = vpop.f32.mrb[9].mxu0 }
 0x1c5   : > { %3286 = vst.msk [vmem:[%s5449_s16 + $0x14] sm:$0xf] %vm3280_vm0, %v3677_v49  ;;  %v3926_v7 = vpop.f32.mrb[10].mxu0 }
 0x1c6   : > { %v3150_v19 = vpop.f32.mrb[11].mxu0 }
 0x1cb   : > { %v3929_v62 = vpop.f32.mrb[12].mxu0 }
 0x1cc   : > { %v3163_v21 = vpop.f32.mrb[13].mxu0 }
 0x1cd   : > { %v3853_v27 = vpop.f32.mrb[8].mxu1  ;;  %v3930_v1 = vpop.f32.mrb[14].mxu0 }
 0x1ce   : > { %v3941_v40 = vadd.f32 %v3925_v15, %v3853_v27  ;;  %v2058_v12 = vpop.f32.mrb[9].mxu1  ;;  %v3166_v61 = vpop.f32.mrb[15].mxu0 }
 0x1cf   : > { %v3942_v29 = vadd.f32 %v3147_v26, %v2058_v12  ;;  %v3854_v18 = vpop.f32.mrb[10].mxu1 }
 0x1d0   : > { %v3210_v42 = vadd.f32 %v3941_v40, %v5441_v13  ;;  %v3943_v37 = vadd.f32 %v3926_v7, %v3854_v18  ;;  %v2061_v45 = vpop.f32.mrb[11].mxu1 }
 0x1d1   : > { %v3208_v34 = vadd.f32 %v3942_v29, %v5441_v13  ;;  %v3944_v25 = vadd.f32 %v3150_v19, %v2061_v45 }
 0x1d2   : > { %v3682_v33 = vpack.c.bf16 %v3210_v42, %v3210_v42  ;;  %v3211_v53 = vadd.f32 %v3943_v37, %v5441_v13 }
 0x1d3   : > { %v3680_v3 = vpack.c.bf16 %v3208_v34, %v3208_v34  ;;  %v3209_v52 = vadd.f32 %v3944_v25, %v5441_v13 }
 0x1d4   : > { %3291 = vst.msk [vmem:[%s5449_s16 + $0x28] sm:$0xf] %vm3280_vm0, %v3682_v33  ;;  %v3683_v35 = vpack.c.bf16 %v3211_v53, %v3211_v53 }
 0x1d5   : > { %3289 = vst.msk [vmem:[%s5449_s16 + $0x20] sm:$0xf] %vm3280_vm0, %v3680_v3  ;;  %v3681_v8 = vpack.c.bf16 %v3209_v52, %v3209_v52  ;;  %v3857_v46 = vpop.f32.mrb[12].mxu1 }
 0x1d6   : > { %3292 = vst.msk [vmem:[%s5449_s16 + $0x2c] sm:$0xf] %vm3280_vm0, %v3683_v35  ;;  %v3945_v36 = vadd.f32 %v3929_v62, %v3857_v46  ;;  %v2074_v10 = vpop.f32.mrb[13].mxu1 }
 0x1d7   : > { %3290 = vst.msk [vmem:[%s5449_s16 + $0x24] sm:$0xf] %vm3280_vm0, %v3681_v8  ;;  %v3946_v56 = vadd.f32 %v3163_v21, %v2074_v10  ;;  %v3858_v41 = vpop.f32.mrb[14].mxu1 }
 0x1d8   : > { %v3214_v16 = vadd.f32 %v3945_v36, %v5441_v13  ;;  %v3947_v4 = vadd.f32 %v3930_v1, %v3858_v41  ;;  %v2077_v63 = vpop.f32.mrb[15].mxu1 }
 0x1d9   : > { %v3212_v23 = vadd.f32 %v3946_v56, %v5441_v13  ;;  %v3948_v20 = vadd.f32 %v3166_v61, %v2077_v63 }
 0x1da   : > { %v3686_v54 = vpack.c.bf16 %v3214_v16, %v3214_v16  ;;  %v3215_v55 = vadd.f32 %v3947_v4, %v5441_v13 }
 0x1db   : > { %v3684_v51 = vpack.c.bf16 %v3212_v23, %v3212_v23  ;;  %v3213_v57 = vadd.f32 %v3948_v20, %v5441_v13 }
 0x1dc   : > { %3295 = vst.msk [vmem:[%s5449_s16 + $0x38] sm:$0xf] %vm3280_vm0, %v3686_v54  ;;  %v3687_v6 = vpack.c.bf16 %v3215_v55, %v3215_v55 }
 0x1dd   : > { %3293 = vst.msk [vmem:[%s5449_s16 + $0x30] sm:$0xf] %vm3280_vm0, %v3684_v51  ;;  %v3685_v50 = vpack.c.bf16 %v3213_v57, %v3213_v57 }
 0x1de   : > { %3296 = vst.msk [vmem:[%s5449_s16 + $0x3c] sm:$0xf] %vm3280_vm0, %v3687_v6 }
 0x1df   : > { %3294 = vst.msk [vmem:[%s5449_s16 + $0x34] sm:$0xf] %vm3280_vm0, %v3685_v50 }
 0x1e0   : > { %4176 = shalt.err (!%p4173_p13)
}
 0x1e1   : > { %s4177_s13 = scalar_lea.hbm %s5495_s17, 1024  ;;  %s4181_s9 = scalar_lea.hbm %s5564_s5, 4096 }
 0x1e2   : > { %p4178_p0 = scmp.ne.s32.totalorder %s5495_s17, %s4177_s13  ;;  %p4182_p4 = scmp.lt.u32.totalorder %s5495_s17, %s5564_s5 }
 0x1e3   : > { %p4183_p5 = scmp.lt.u32.totalorder %s4181_s9, %s4177_s13  ;;  %p4185_p7 = scmp.lt.u32.totalorder %s4177_s13, %s5495_s17 }
 0x1e4   : > { %p4179_p1 = pnand %p4178_p0, %p4343_p3 }
 0x1e5   : > { %p4184_p6 = por %p4183_p5, %p4182_p4 }
 0x1e6   : > { %p4180_p2 = pneg %p4179_p1 }
 0x1e7   : > { %p4186_p9 = por %p4185_p7, %p4184_p6 }
 0x1e9   : > { %p4187_p10 = pnand %p4186_p9, %p4180_p2 }
 0x1eb   : > { %4190 = shalt.err (!%p4187_p10)
}
 0x1ec   : > { %s4260_s10 = smov 64   ;;  %s4261_s14 = smov 4  }
 0x1ed   : > { %4071 = dma.vmem_to_hbm [thread:$0]  (%p4343_p3), %s5497_s22, 1024, %s5495_s17, %s5507_s12, %s4260_s10, %s4260_s10, %s4261_s14  }
 0x1ee PF: > { %p4077_p11 = scmp.ge.s32.totalorder %s4257_s25, 2  ;;  %s3328_s26 = sand.u32 1, %s4229_s18  }
 0x1ef   : > { %s3329_s15 = scalar_lea.sflag [#allocation4], %s3328_s26 }
 0x1f0   : > { %p4074_p12 = pnand %p4077_p11, %p4352_p8 }
 0x1f2   : > { %4224 = dma.done.wait (!%p4074_p12), %s3329_s15, 1024  }
 0x1f3   : > { %4226 = vsyncadd (!%p4074_p12), %s3329_s15, 4294966272  ;;  %s18_s25 = sadd.s32 1, %s4257_s25   ;;  %s5612_s18 = smov %s4233_s19 }
 0x1f4   : > { %p15_p13 = scmp.ge.s32.totalorder %s18_s25, 6   ;;  %s5613_s19 = smov %s4237_s20 }
 0x1f5   : > { %s5614_s20 = smov %s4361_s11  ;;  %s5615_s21 = smov %s4249_s23 }
 0x1f6   : > { %s5616_s22 = smov %s4253_s24  ;;  %s5617_s23 = smov %s5620_s28 }
 0x1f7   : > { %s5618_s24 = smov %s5624_s29  ;;  %17 = sbr.rel (!%p15_p13) target bundleno = 5 (0x5), region = 92 }
 0x1fe   :  { %3334 = vsyncpa [#allocation4], 1 }
 0x1ff   :  { %3336 = vsyncpa [#allocation4 + $0x1], 1 }

</bundles_post_ra>
